<compile_context>
chip_gen: v7x
topology: tpu7x:2x2x1
jax: 0.10.0
libtpu: 0.0.40
codegen_flags: <defaults>
</compile_context>

<pallas_src>
import functools
import math

import jax
import jax.numpy as jnp
from jax import lax
from jax.experimental import pallas as pl
from jax.experimental.pallas import tpu as pltpu


def _round_up(v, m):
    return (v + m - 1) // m * m


def _sim_max_loss_kernel(xn_ref, out_ref, st_ref, *, n_real, tile_m, chunk, alpha):
    """One grid step = one tile of `tile_m` query rows.

    xn_ref : (n_pad, c_pad) f32, L2-normalized rows (padded rows/cols are 0).
             Constant block index -> DMA'd into VMEM once and reused.
    out_ref: (1, 1, tile_m) f32 lane-dense per-query-row weighted-loss sums.
    st_ref : (n_pad, tile_m) f32 scratch, st[j, r] = clamp(cos(query r, key j)),
             with padded key rows forced to 0.0 (a value no valid sim can take).
    """
    i = pl.program_id(0)
    n_pad = xn_ref.shape[0]

    keys = xn_ref[...]                                     # (n_pad, c_pad)
    row0 = pl.multiple_of(i * tile_m, tile_m)
    q = xn_ref[pl.ds(row0, tile_m), :]                     # (tile_m, c_pad)

    # Transposed similarity tile on the MXU: st[j, r] = <key_j, q_r>.
    st = lax.dot_general(keys, q, (((1,), (1,)), ((), ())),
                         preferred_element_type=jnp.float32)
    st = jnp.clip(st, 0.0005, 0.9995)
    # Padded key rows -> 0.0: never > or == any valid (>= 0.0005) sim, so the
    # counting loop needs no per-iteration validity test and may run past
    # n_real up to a multiple of the unroll factor.
    key_row = lax.broadcasted_iota(jnp.int32, (n_pad, tile_m), 0)
    st = jnp.where(key_row < n_real, st, 0.0)
    st_ref[...] = st

    # Query-row validity (columns of st); constant across chunks.
    qcol = lax.broadcasted_iota(jnp.int32, (1, tile_m), 1)
    q_valid = (row0 + qcol) < n_real                       # (1, tile_m)

    UNROLL = 8
    k_stop = _round_up(n_real, UNROLL)                     # static, <= n_pad
    n_chunks = n_pad // chunk                              # static

    # Closed-form tie-group weights: the tie group of element j (size m,
    # strictly-greater count g) occupies ranks g-1 .. g+m-2, so
    #   sum_t exp(-alpha*(g-1+t)) = exp(-alpha*(g-1)) * (1-qa^m)/(1-qa)
    # and the per-element (group-average) weight divides by m.
    qa = math.exp(-alpha)
    inv_denom = 1.0 / (1.0 - qa) if alpha != 0.0 else 1.0

    def chunk_body(c, row_acc):
        j0 = pl.multiple_of(c * chunk, chunk)
        st_c = st_ref[pl.ds(j0, chunk), :]                 # (chunk, tile_m), vreg-resident

        def kb_body(kb, carry):
            gt, eq = carry
            base = pl.multiple_of(kb * UNROLL, UNROLL)
            for u in range(UNROLL):                        # manual 8x unroll
                sk = st_ref[pl.ds(base + u, 1), :]         # (1, tile_m): sim[r, k]
                gt = gt + (sk > st_c).astype(jnp.int32)
                eq = eq + (sk == st_c).astype(jnp.int32)
            return gt, eq

        zeros = jnp.zeros((chunk, tile_m), jnp.int32)
        gt, eq = lax.fori_loop(0, k_stop // UNROLL, kb_body, (zeros, zeros))

        g_f = gt.astype(jnp.float32)
        m_f = eq.astype(jnp.float32)
        loss_c = -jnp.log(st_c)                            # relu dropped (sim <= 0.9995)
        if alpha != 0.0:
            w = (jnp.exp(alpha * (1.0 - g_f))
                 * (1.0 - jnp.exp(-alpha * m_f)) * inv_denom
                 / jnp.maximum(m_f, 1.0))
        else:
            w = jnp.ones_like(m_f)

        # Valid = real key row (padded rows were forced to 0.0) AND real query row.
        valid = (st_c > 0.0) & q_valid
        contrib = jnp.where(valid, loss_c * w, 0.0)
        return row_acc + jnp.sum(contrib, axis=0, keepdims=True)

    row_sums = lax.fori_loop(0, n_chunks, chunk_body,
                             jnp.zeros((1, tile_m), jnp.float32))
    out_ref[...] = row_sums.reshape(1, 1, tile_m)


def sim_max_loss(x, *, alpha=0.25, reduction="mean", tile_m=128, eps=1e-12):
    """Pallas TPU implementation of SimMaxLoss(metric='cos').forward(x)."""
    assert tile_m % 8 == 0, "tile_m must be a multiple of 8 (sublane width)"
    n, c = x.shape
    n_pad = _round_up(n, tile_m)
    c_pad = _round_up(c, 128)
    num_tiles = n_pad // tile_m
    chunk = min(64, tile_m)                    # register-resident key chunk
    assert n_pad % chunk == 0

    # F.normalize(dim=1): x / max(||x||_2, eps) -- once, outside the grid.
    xf = x.astype(jnp.float32)
    nrm = jnp.sqrt(jnp.sum(xf * xf, axis=1, keepdims=True))
    xn = xf / jnp.maximum(nrm, eps)
    xp = jnp.zeros((n_pad, c_pad), jnp.float32).at[:n, :c].set(xn)

    # Derived VMEM budget: double-buffered resident input + st scratch + outs.
    footprint = (2 * n_pad * c_pad * 4) + (n_pad * tile_m * 4) + (2 * tile_m * 4)
    vmem_limit = int(min(max(footprint + (4 << 20), 16 << 20), 60 << 20))

    kernel = functools.partial(_sim_max_loss_kernel, n_real=n, tile_m=tile_m,
                               chunk=chunk, alpha=float(alpha))

    row_sums = pl.pallas_call(
        kernel,
        out_shape=jax.ShapeDtypeStruct((num_tiles, 1, tile_m), jnp.float32),
        grid_spec=pltpu.PrefetchScalarGridSpec(
            num_scalar_prefetch=0,
            grid=(num_tiles,),
            in_specs=[
                # Whole normalized matrix resident in VMEM; constant block
                # index -> fetched once, queries sliced from it in-kernel.
                pl.BlockSpec((n_pad, c_pad), lambda i: (0, 0)),
            ],
            out_specs=pl.BlockSpec((1, 1, tile_m), lambda i: (i, 0, 0)),
            scratch_shapes=[pltpu.VMEM((n_pad, tile_m), jnp.float32)],
        ),
        compiler_params=pltpu.CompilerParams(
            dimension_semantics=("parallel",),   # shards query tiles over TCs (v7x)
            vmem_limit_bytes=vmem_limit,
        ),
    )(xp)

    total = jnp.sum(row_sums)                    # padded entries are zeroed
    if reduction == "mean":
        return total / jnp.float32(n * n)
    elif reduction == "sum":
        return total
    else:
        raise NotImplementedError(reduction)


def _reference(x, *, alpha=0.25, eps=1e-12):
    """Pure-JAX reference mirroring the torch module (stable tie-break)."""
    xn = x / jnp.maximum(jnp.sqrt(jnp.sum(x * x, axis=1, keepdims=True)), eps)
    sim = jnp.clip(jnp.matmul(xn, xn.T, precision=lax.Precision.HIGHEST),
                   0.0005, 0.9995)
    loss = jnp.maximum(-jnp.log(sim), 0.0)
    indices = jnp.argsort(-sim, axis=1)          # descending, stable
    rank = jnp.argsort(indices, axis=1) - 1
    w = jnp.exp(-rank.astype(jnp.float32) * alpha)
    return jnp.mean(loss * w)


if __name__ == "__main__":
    key = jax.random.PRNGKey(0)
    N, C = 24, 40                                # small [N, C] embedding batch
    x = jax.random.normal(key, (N, C), dtype=jnp.float32)

    out = sim_max_loss(x, alpha=0.25, reduction="mean")
    out = jax.block_until_ready(out)

    ref = _reference(x, alpha=0.25)
    assert jnp.allclose(out, ref, rtol=1e-4, atol=1e-6), (out, ref)

    print("KERNEL_OK")
</pallas_src>

<mosaic_0001>
module attributes {stable_mosaic.version = 11 : i64} {
  func.func @_sim_max_loss_kernel(%arg0: i32, %arg1: memref<128x128xf32, #tpu.memory_space<vmem>>, %arg2: memref<1x1x128xf32, #tpu.memory_space<vmem>>, %arg3: memref<128x128xf32, #tpu.memory_space<vmem>>) attributes {dimension_semantics = [#tpu.dimension_semantics<parallel>], iteration_bounds = array<i64: 1>, scalar_prefetch = 0 : i64, scratch_operands = 1 : i64, tpu.core_type = #tpu.core_type<tc>, window_params = [{pipeline_mode = #tpu.pipeline_mode<synchronous>, transform_indices = @transform_0, window_bounds = array<i64: 128, 128>}, {transform_indices = @transform_1, window_bounds = array<i64: 1, 1, 128>}]} {
    %c0 = arith.constant 0 : index
    %c0_0 = arith.constant 0 : index
    %0 = vector.load %arg1[%c0, %c0_0] : memref<128x128xf32, #tpu.memory_space<vmem>>, vector<128x128xf32>
    %c128_i32 = arith.constant 128 : i32
    %1 = arith.muli %arg0, %c128_i32 : i32
    %2 = tpu.assume_multiple %1, 128 : i32
    %3 = arith.index_cast %2 : i32 to index
    %c0_1 = arith.constant 0 : index
    %4 = vector.load %arg1[%3, %c0_1] : memref<128x128xf32, #tpu.memory_space<vmem>>, vector<128x128xf32>
    %cst = arith.constant dense<0.000000e+00> : vector<128x128xf32>
    %5 = tpu.matmul %0, %4, %cst {dimension_numbers = #tpu.dot_dimension_numbers<[1], [1], [0], [0], [0, 0, 1, 0], [], []>} : vector<128x128xf32>, vector<128x128xf32>, vector<128x128xf32> -> vector<128x128xf32>
    %cst_2 = arith.constant 5.000000e-04 : f32
    %cst_3 = arith.constant 0.999499976 : f32
    %6 = vector.broadcast %cst_2 : f32 to vector<128x128xf32>
    %7 = arith.maximumf %6, %5 : vector<128x128xf32>
    %8 = vector.broadcast %cst_3 : f32 to vector<128x128xf32>
    %9 = arith.minimumf %8, %7 : vector<128x128xf32>
    %10 = tpu.iota {dimensions = array<i32: 0>} : vector<128x128xi32>
    %c24_i32 = arith.constant 24 : i32
    %11 = vector.broadcast %c24_i32 : i32 to vector<128x128xi32>
    %12 = arith.cmpi slt, %10, %11 : vector<128x128xi32>
    %cst_4 = arith.constant 0.000000e+00 : f32
    %13 = vector.broadcast %cst_4 : f32 to vector<128x128xf32>
    %14 = arith.select %12, %9, %13 : vector<128x128xi1>, vector<128x128xf32>
    %c0_5 = arith.constant 0 : index
    %c0_6 = arith.constant 0 : index
    %15 = vector.load %arg3[%c0_5, %c0_6] : memref<128x128xf32, #tpu.memory_space<vmem>>, vector<128x128xf32>
    tpu.vector_store %arg3[%c0_5, %c0_6], %14 {strides = array<i32>} : memref<128x128xf32, #tpu.memory_space<vmem>>, vector<128x128xf32>,
    %16 = tpu.iota {dimensions = array<i32: 1>} : vector<1x128xi32>
    %17 = vector.broadcast %2 : i32 to vector<1x128xi32>
    %18 = arith.addi %17, %16 : vector<1x128xi32>
    %c24_i32_7 = arith.constant 24 : i32
    %19 = vector.broadcast %c24_i32_7 : i32 to vector<1x128xi32>
    %20 = arith.cmpi slt, %18, %19 : vector<1x128xi32>
    %cst_8 = arith.constant 0.000000e+00 : f32
    %21 = vector.broadcast %cst_8 : f32 to vector<1x128xf32>
    %c0_i32 = arith.constant 0 : i32
    %c2_i32 = arith.constant 2 : i32
    %22 = arith.addi %c0_i32, %c2_i32 : i32
    %c1_i32 = arith.constant 1 : i32
    %23 = scf.for %arg4 = %c0_i32 to %22 step %c1_i32 iter_args(%arg5 = %21) -> (vector<1x128xf32>)  : i32 {
      %c64_i32 = arith.constant 64 : i32
      %26 = arith.muli %arg4, %c64_i32 : i32
      %27 = tpu.assume_multiple %26, 64 : i32
      %28 = arith.index_cast %27 : i32 to index
      %c0_13 = arith.constant 0 : index
      %29 = vector.load %arg3[%28, %c0_13] : memref<128x128xf32, #tpu.memory_space<vmem>>, vector<64x128xf32>
      %c0_i32_14 = arith.constant 0 : i32
      %30 = vector.broadcast %c0_i32_14 : i32 to vector<64x128xi32>
      %c0_i32_15 = arith.constant 0 : i32
      %c3_i32 = arith.constant 3 : i32
      %31 = arith.addi %c0_i32_15, %c3_i32 : i32
      %c1_i32_16 = arith.constant 1 : i32
      %32:2 = scf.for %arg6 = %c0_i32_15 to %31 step %c1_i32_16 iter_args(%arg7 = %30, %arg8 = %30) -> (vector<64x128xi32>, vector<64x128xi32>)  : i32 {
        %c8_i32 = arith.constant 8 : i32
        %64 = arith.muli %arg6, %c8_i32 : i32
        %65 = tpu.assume_multiple %64, 8 : i32
        %c0_i32_28 = arith.constant 0 : i32
        %66 = arith.addi %65, %c0_i32_28 : i32
        %67 = arith.index_cast %66 : i32 to index
        %c0_29 = arith.constant 0 : index
        %68 = vector.load %arg3[%67, %c0_29] : memref<128x128xf32, #tpu.memory_space<vmem>>, vector<1x128xf32>
        %69 = vector.broadcast %68 : vector<1x128xf32> to vector<64x128xf32>
        %70 = arith.cmpf ogt, %69, %29 : vector<64x128xf32>
        %71 = arith.extui %70 : vector<64x128xi1> to vector<64x128xi32>
        %72 = arith.addi %arg7, %71 : vector<64x128xi32>
        %73 = vector.broadcast %68 : vector<1x128xf32> to vector<64x128xf32>
        %74 = arith.cmpf oeq, %73, %29 : vector<64x128xf32>
        %75 = arith.extui %74 : vector<64x128xi1> to vector<64x128xi32>
        %76 = arith.addi %arg8, %75 : vector<64x128xi32>
        %c1_i32_30 = arith.constant 1 : i32
        %77 = arith.addi %65, %c1_i32_30 : i32
        %78 = arith.index_cast %77 : i32 to index
        %c0_31 = arith.constant 0 : index
        %79 = vector.load %arg3[%78, %c0_31] : memref<128x128xf32, #tpu.memory_space<vmem>>, vector<1x128xf32>
        %80 = vector.broadcast %79 : vector<1x128xf32> to vector<64x128xf32>
        %81 = arith.cmpf ogt, %80, %29 : vector<64x128xf32>
        %82 = arith.extui %81 : vector<64x128xi1> to vector<64x128xi32>
        %83 = arith.addi %72, %82 : vector<64x128xi32>
        %84 = vector.broadcast %79 : vector<1x128xf32> to vector<64x128xf32>
        %85 = arith.cmpf oeq, %84, %29 : vector<64x128xf32>
        %86 = arith.extui %85 : vector<64x128xi1> to vector<64x128xi32>
        %87 = arith.addi %76, %86 : vector<64x128xi32>
        %c2_i32_32 = arith.constant 2 : i32
        %88 = arith.addi %65, %c2_i32_32 : i32
        %89 = arith.index_cast %88 : i32 to index
        %c0_33 = arith.constant 0 : index
        %90 = vector.load %arg3[%89, %c0_33] : memref<128x128xf32, #tpu.memory_space<vmem>>, vector<1x128xf32>
        %91 = vector.broadcast %90 : vector<1x128xf32> to vector<64x128xf32>
        %92 = arith.cmpf ogt, %91, %29 : vector<64x128xf32>
        %93 = arith.extui %92 : vector<64x128xi1> to vector<64x128xi32>
        %94 = arith.addi %83, %93 : vector<64x128xi32>
        %95 = vector.broadcast %90 : vector<1x128xf32> to vector<64x128xf32>
        %96 = arith.cmpf oeq, %95, %29 : vector<64x128xf32>
        %97 = arith.extui %96 : vector<64x128xi1> to vector<64x128xi32>
        %98 = arith.addi %87, %97 : vector<64x128xi32>
        %c3_i32_34 = arith.constant 3 : i32
        %99 = arith.addi %65, %c3_i32_34 : i32
        %100 = arith.index_cast %99 : i32 to index
        %c0_35 = arith.constant 0 : index
        %101 = vector.load %arg3[%100, %c0_35] : memref<128x128xf32, #tpu.memory_space<vmem>>, vector<1x128xf32>
        %102 = vector.broadcast %101 : vector<1x128xf32> to vector<64x128xf32>
        %103 = arith.cmpf ogt, %102, %29 : vector<64x128xf32>
        %104 = arith.extui %103 : vector<64x128xi1> to vector<64x128xi32>
        %105 = arith.addi %94, %104 : vector<64x128xi32>
        %106 = vector.broadcast %101 : vector<1x128xf32> to vector<64x128xf32>
        %107 = arith.cmpf oeq, %106, %29 : vector<64x128xf32>
        %108 = arith.extui %107 : vector<64x128xi1> to vector<64x128xi32>
        %109 = arith.addi %98, %108 : vector<64x128xi32>
        %c4_i32 = arith.constant 4 : i32
        %110 = arith.addi %65, %c4_i32 : i32
        %111 = arith.index_cast %110 : i32 to index
        %c0_36 = arith.constant 0 : index
        %112 = vector.load %arg3[%111, %c0_36] : memref<128x128xf32, #tpu.memory_space<vmem>>, vector<1x128xf32>
        %113 = vector.broadcast %112 : vector<1x128xf32> to vector<64x128xf32>
        %114 = arith.cmpf ogt, %113, %29 : vector<64x128xf32>
        %115 = arith.extui %114 : vector<64x128xi1> to vector<64x128xi32>
        %116 = arith.addi %105, %115 : vector<64x128xi32>
        %117 = vector.broadcast %112 : vector<1x128xf32> to vector<64x128xf32>
        %118 = arith.cmpf oeq, %117, %29 : vector<64x128xf32>
        %119 = arith.extui %118 : vector<64x128xi1> to vector<64x128xi32>
        %120 = arith.addi %109, %119 : vector<64x128xi32>
        %c5_i32 = arith.constant 5 : i32
        %121 = arith.addi %65, %c5_i32 : i32
        %122 = arith.index_cast %121 : i32 to index
        %c0_37 = arith.constant 0 : index
        %123 = vector.load %arg3[%122, %c0_37] : memref<128x128xf32, #tpu.memory_space<vmem>>, vector<1x128xf32>
        %124 = vector.broadcast %123 : vector<1x128xf32> to vector<64x128xf32>
        %125 = arith.cmpf ogt, %124, %29 : vector<64x128xf32>
        %126 = arith.extui %125 : vector<64x128xi1> to vector<64x128xi32>
        %127 = arith.addi %116, %126 : vector<64x128xi32>
        %128 = vector.broadcast %123 : vector<1x128xf32> to vector<64x128xf32>
        %129 = arith.cmpf oeq, %128, %29 : vector<64x128xf32>
        %130 = arith.extui %129 : vector<64x128xi1> to vector<64x128xi32>
        %131 = arith.addi %120, %130 : vector<64x128xi32>
        %c6_i32 = arith.constant 6 : i32
        %132 = arith.addi %65, %c6_i32 : i32
        %133 = arith.index_cast %132 : i32 to index
        %c0_38 = arith.constant 0 : index
        %134 = vector.load %arg3[%133, %c0_38] : memref<128x128xf32, #tpu.memory_space<vmem>>, vector<1x128xf32>
        %135 = vector.broadcast %134 : vector<1x128xf32> to vector<64x128xf32>
        %136 = arith.cmpf ogt, %135, %29 : vector<64x128xf32>
        %137 = arith.extui %136 : vector<64x128xi1> to vector<64x128xi32>
        %138 = arith.addi %127, %137 : vector<64x128xi32>
        %139 = vector.broadcast %134 : vector<1x128xf32> to vector<64x128xf32>
        %140 = arith.cmpf oeq, %139, %29 : vector<64x128xf32>
        %141 = arith.extui %140 : vector<64x128xi1> to vector<64x128xi32>
        %142 = arith.addi %131, %141 : vector<64x128xi32>
        %c7_i32 = arith.constant 7 : i32
        %143 = arith.addi %65, %c7_i32 : i32
        %144 = arith.index_cast %143 : i32 to index
        %c0_39 = arith.constant 0 : index
        %145 = vector.load %arg3[%144, %c0_39] : memref<128x128xf32, #tpu.memory_space<vmem>>, vector<1x128xf32>
        %146 = vector.broadcast %145 : vector<1x128xf32> to vector<64x128xf32>
        %147 = arith.cmpf ogt, %146, %29 : vector<64x128xf32>
        %148 = arith.extui %147 : vector<64x128xi1> to vector<64x128xi32>
        %149 = arith.addi %138, %148 : vector<64x128xi32>
        %150 = vector.broadcast %145 : vector<1x128xf32> to vector<64x128xf32>
        %151 = arith.cmpf oeq, %150, %29 : vector<64x128xf32>
        %152 = arith.extui %151 : vector<64x128xi1> to vector<64x128xi32>
        %153 = arith.addi %142, %152 : vector<64x128xi32>
        scf.yield %149, %153 : vector<64x128xi32>, vector<64x128xi32>
      }
      %c3_i32_17 = arith.constant 3 : i32
      %33 = arith.sitofp %32#0 : vector<64x128xi32> to vector<64x128xf32>
      %34 = arith.sitofp %32#1 : vector<64x128xi32> to vector<64x128xf32>
      %35 = math.log %29 : vector<64x128xf32>
      %cst_18 = arith.constant 0.000000e+00 : f32
      %36 = vector.broadcast %cst_18 : f32 to vector<64x128xf32>
      %37 = arith.subf %36, %35 : vector<64x128xf32>
      %cst_19 = arith.constant 1.000000e+00 : f32
      %38 = vector.broadcast %cst_19 : f32 to vector<64x128xf32>
      %39 = arith.subf %38, %33 : vector<64x128xf32>
      %cst_20 = arith.constant 2.500000e-01 : f32
      %40 = vector.broadcast %cst_20 : f32 to vector<64x128xf32>
      %41 = arith.mulf %40, %39 : vector<64x128xf32>
      %42 = math.exp %41 : vector<64x128xf32>
      %cst_21 = arith.constant -2.500000e-01 : f32
      %43 = vector.broadcast %cst_21 : f32 to vector<64x128xf32>
      %44 = arith.mulf %43, %34 : vector<64x128xf32>
      %45 = math.exp %44 : vector<64x128xf32>
      %cst_22 = arith.constant 1.000000e+00 : f32
      %46 = vector.broadcast %cst_22 : f32 to vector<64x128xf32>
      %47 = arith.subf %46, %45 : vector<64x128xf32>
      %48 = arith.mulf %42, %47 : vector<64x128xf32>
      %cst_23 = arith.constant 4.52081156 : f32
      %49 = vector.broadcast %cst_23 : f32 to vector<64x128xf32>
      %50 = arith.mulf %48, %49 : vector<64x128xf32>
      %cst_24 = arith.constant 1.000000e+00 : f32
      %51 = vector.broadcast %cst_24 : f32 to vector<64x128xf32>
      %52 = arith.maximumf %34, %51 : vector<64x128xf32>
      %53 = arith.divf %50, %52 : vector<64x128xf32>
      %cst_25 = arith.constant 0.000000e+00 : f32
      %54 = vector.broadcast %cst_25 : f32 to vector<64x128xf32>
      %55 = arith.cmpf ogt, %29, %54 : vector<64x128xf32>
      %56 = vector.broadcast %20 : vector<1x128xi1> to vector<64x128xi1>
      %57 = arith.andi %55, %56 : vector<64x128xi1>
      %58 = arith.mulf %37, %53 : vector<64x128xf32>
      %cst_26 = arith.constant 0.000000e+00 : f32
      %59 = vector.broadcast %cst_26 : f32 to vector<64x128xf32>
      %60 = arith.select %57, %58, %59 : vector<64x128xi1>, vector<64x128xf32>
      %cst_27 = arith.constant dense<0.000000e+00> : vector<128xf32>
      %61 = vector.multi_reduction <add>, %60, %cst_27 [0] : vector<64x128xf32> to vector<128xf32>
      %62 = vector.shape_cast %61 : vector<128xf32> to vector<1x128xf32>
      %63 = arith.addf %arg5, %62 : vector<1x128xf32>
      scf.yield %63 : vector<1x128xf32>
    }
    %c2_i32_9 = arith.constant 2 : i32
    %24 = vector.shape_cast %23 : vector<1x128xf32> to vector<1x1x128xf32>
    %c0_10 = arith.constant 0 : index
    %c0_11 = arith.constant 0 : index
    %c0_12 = arith.constant 0 : index
    %25 = vector.load %arg2[%c0_10, %c0_11, %c0_12] : memref<1x1x128xf32, #tpu.memory_space<vmem>>, vector<1x1x128xf32>
    tpu.vector_store %arg2[%c0_10, %c0_11, %c0_12], %24 {strides = array<i32>} : memref<1x1x128xf32, #tpu.memory_space<vmem>>, vector<1x1x128xf32>,
    return
  }
  func.func @transform_0(%arg0: i32) -> (i32, i32) {
    %c0_i32 = arith.constant 0 : i32
    %c0_i32_0 = arith.constant 0 : i32
    %c0_i32_1 = arith.constant 0 : i32
    return %c0_i32, %c0_i32_0 : i32, i32
  }
  func.func @transform_1(%arg0: i32) -> (i32, i32, i32) {
    %c0_i32 = arith.constant 0 : i32
    %c0_i32_0 = arith.constant 0 : i32
    %c0_i32_1 = arith.constant 0 : i32
    return %arg0, %c0_i32, %c0_i32_0 : i32, i32, i32
  }
}

</mosaic_0001>

<bundles_post_ra>
// kernel: tpu_custom_call.1
= control target key start
LH: loop header
LB: loop body
LE: loop exit
PB: predicated region body
PF: predicated region fallthrough
CT: control target
= control target key end

     0   :  { %6 = vsyncpa [#allocation4], 0  ;;  %s2288_s0 = inlined_call_operand.hbm [shape: f32[128,128], index: 0, kind: input, shape index: {}]   ;;  %s2289_s1 = inlined_call_operand.hbm [shape: f32[1,1,128], index: 1, kind: output, shape index: {}]  }
   0x1   :  { %7 = vsyncpa [#allocation5], 0  ;;  %s1659_s6 = smov [#allocation3]   ;;  %s1459_s10 = scalar_lea.hbm %s2288_s0, 2048 }
   0x2   :  { %s13_s7 = sshll.u32 %s1659_s6, 4  ;;  %p1460_p0 = scmp.ne.s32.totalorder %s2288_s0, %s1459_s10  ;;  %s14_s7 = int_to_ptr.vmem [resolvable:$true] %s13_s7 }
   0x3   :  { %p1463_p1 = scmp.lt.u32.totalorder %s1459_s10, %s2288_s0 }
   0x5   :  { %p1465_p2 = pnand %p1463_p1, %p1460_p0 }
   0x7   :  { %1468 = shalt.err (!%p1465_p2)
}
   0x8   :  { %s1469_s15 = scalar_lea.vmem %s14_s7, 2048  ;;  %p1474_p4 = scmp.lt.s32.totalorder %s14_s7, %s14_s7 }
   0x9   :  { %p1470_p3 = scmp.ne.s32.totalorder %s14_s7, %s1469_s15  ;;  %p1475_p5 = scmp.lt.s32.totalorder %s1469_s15, %s1469_s15 }
   0xb   :  { %p1476_p6 = por %p1475_p5, %p1474_p4 }
   0xd   :  { %p1477_p7 = pnand %p1476_p6, %p1470_p3 }
   0xf   :  { %1480 = shalt.err (!%p1477_p7)
}
  0x10   :  { %s1660_s16 = smov 128   ;;  %s1661_s17 = smov 8  }
  0x11   :  { %19 = dma.hbm_to_vmem [thread:$0]  %s2288_s0, 2048, %s14_s7, [#allocation4], %s1660_s16, %s1660_s16, %s1661_s17  }
  0x12   :  { %1579 = dma.done.wait [#allocation4], 2048  }
  0x13   :  { %1580 = vsyncadd [#allocation4], 4294965248  ;;  %v1662_v0 = vmov 0.0   ;;  %v41_v1 = vld [vmem:[#allocation3] sm:$0xff]  ;;  %v42_v2 = vld [vmem:[#allocation3 + $0x8] sm:$0xff]  ;;  %v299_v25 = vlaneseq  ;;  %v1690_v49 = vmov 0.0  }
  0x14   :  { %286 = vst [vmem:[#allocation2 + $0x18] sm:$0xff] %v1662_v0  ;;  %287 = vst [vmem:[#allocation2 + $0x20] sm:$0xff] %v1662_v0  ;;  %v43_v3 = vld [vmem:[#allocation3 + $0x10] sm:$0xff]  ;;  %v1189_v4 = vpack.c.bf16 %v42_v2, %v41_v1  ;;  %v44_v5 = vld [vmem:[#allocation3 + $0x18] sm:$0xff]  ;;  %1165 = vmatprep.mubr.f32.mxu0 %v41_v1  ;;  %s1692_s0 = smov 0  }
  0x15   :  { %288 = vst [vmem:[#allocation2 + $0x28] sm:$0xff] %v1662_v0  ;;  %289 = vst [vmem:[#allocation2 + $0x30] sm:$0xff] %v1662_v0  ;;  %v1193_v6 = vpack.c.bf16 %v44_v5, %v43_v3  ;;  %v49_v7 = vld [vmem:[#allocation3 + $0x40] sm:$0xff]  ;;  %v46_v9 = vld [vmem:[#allocation3 + $0x28] sm:$0xff]  ;;  %v1687_v26 = vand.u32 127, %v299_v25 }
  0x16   :  { %290 = vst [vmem:[#allocation2 + $0x38] sm:$0xff] %v1662_v0  ;;  %291 = vst [vmem:[#allocation2 + $0x40] sm:$0xff] %v1662_v0  ;;  %1190 = vmatprep.subr.bf16.mxu0 %v1189_v4  ;;  %1221 = vmatprep.subr.bf16.mxu1 %v1189_v4  ;;  %v45_v8 = vld [vmem:[#allocation3 + $0x20] sm:$0xff]  ;;  %v47_v11 = vld [vmem:[#allocation3 + $0x30] sm:$0xff] }
  0x17   :  { %292 = vst [vmem:[#allocation2 + $0x48] sm:$0xff] %v1662_v0  ;;  %293 = vst [vmem:[#allocation2 + $0x50] sm:$0xff] %v1662_v0  ;;  %1192 = vmatpush3.bf16.xpose.msra.mxu0 %v1189_v4  ;;  %1229 = vmatpush3.bf16.xpose.msra.mxu1 %v1189_v4  ;;  %v1197_v10 = vpack.c.bf16 %v46_v9, %v45_v8  ;;  %v48_v12 = vld [vmem:[#allocation3 + $0x38] sm:$0xff]  ;;  %v50_v14 = vld [vmem:[#allocation3 + $0x48] sm:$0xff]  ;;  %vm303_vm0 = vcmp.lt.s32.totalorder %v1687_v26, 24 }
  0x18   :  { %294 = vst [vmem:[#allocation2 + $0x58] sm:$0xff] %v1662_v0  ;;  %295 = vst [vmem:[#allocation2 + $0x60] sm:$0xff] %v1662_v0  ;;  %1194 = vmatprep.subr.bf16.mxu0 %v1193_v6  ;;  %1222 = vmatprep.subr.bf16.mxu1 %v1193_v6  ;;  %v1201_v13 = vpack.c.bf16 %v48_v12, %v47_v11  ;;  %v1205_v15 = vpack.c.bf16 %v50_v14, %v49_v7  ;;  %v51_v16 = vld [vmem:[#allocation3 + $0x50] sm:$0xff]  ;;  %v52_v17 = vld [vmem:[#allocation3 + $0x58] sm:$0xff] }
  0x19   :  { %296 = vst [vmem:[#allocation2 + $0x68] sm:$0xff] %v1662_v0  ;;  %297 = vst [vmem:[#allocation2 + $0x70] sm:$0xff] %v1662_v0  ;;  %1177 = vmatprep.mubr.f32.mxu1 %v49_v7  ;;  %v1209_v18 = vpack.c.bf16 %v52_v17, %v51_v16  ;;  %v53_v19 = vld [vmem:[#allocation3 + $0x60] sm:$0xff]  ;;  %v54_v20 = vld [vmem:[#allocation3 + $0x68] sm:$0xff] }
  0x1a   :  { %298 = vst [vmem:[#allocation2 + $0x78] sm:$0xff] %v1662_v0  ;;  %v1213_v21 = vpack.c.bf16 %v54_v20, %v53_v19  ;;  %v55_v22 = vld [vmem:[#allocation3 + $0x70] sm:$0xff]  ;;  %v56_v23 = vld [vmem:[#allocation3 + $0x78] sm:$0xff] }
  0x1b   :  { %v1217_v24 = vpack.c.bf16 %v56_v23, %v55_v22 }
  0x1f   :  { %1196 = vmatpush3.bf16.xpose.msra.mxu0 %v1193_v6  ;;  %1230 = vmatpush3.bf16.xpose.msra.mxu1 %v1193_v6 }
  0x20   :  { %1198 = vmatprep.subr.bf16.mxu0 %v1197_v10  ;;  %1223 = vmatprep.subr.bf16.mxu1 %v1197_v10 }
  0x27   :  { %1200 = vmatpush3.bf16.xpose.msra.mxu0 %v1197_v10  ;;  %1231 = vmatpush3.bf16.xpose.msra.mxu1 %v1197_v10 }
  0x28   :  { %1202 = vmatprep.subr.bf16.mxu0 %v1201_v13  ;;  %1224 = vmatprep.subr.bf16.mxu1 %v1201_v13 }
  0x2f   :  { %1204 = vmatpush3.bf16.xpose.msra.mxu0 %v1201_v13  ;;  %1232 = vmatpush3.bf16.xpose.msra.mxu1 %v1201_v13 }
  0x30   :  { %1206 = vmatprep.subr.bf16.mxu0 %v1205_v15  ;;  %1225 = vmatprep.subr.bf16.mxu1 %v1205_v15 }
  0x37   :  { %1208 = vmatpush3.bf16.xpose.msra.mxu0 %v1205_v15  ;;  %1233 = vmatpush3.bf16.xpose.msra.mxu1 %v1205_v15 }
  0x38   :  { %1210 = vmatprep.subr.bf16.mxu0 %v1209_v18  ;;  %1226 = vmatprep.subr.bf16.mxu1 %v1209_v18 }
  0x3f   :  { %1212 = vmatpush3.bf16.xpose.msra.mxu0 %v1209_v18  ;;  %1234 = vmatpush3.bf16.xpose.msra.mxu1 %v1209_v18 }
  0x40   :  { %1214 = vmatprep.subr.bf16.mxu0 %v1213_v21  ;;  %1227 = vmatprep.subr.bf16.mxu1 %v1213_v21 }
  0x47   :  { %1216 = vmatpush3.bf16.xpose.msra.mxu0 %v1213_v21  ;;  %1235 = vmatpush3.bf16.xpose.msra.mxu1 %v1213_v21 }
  0x48   :  { %1218 = vmatprep.subr.bf16.mxu0 %v1217_v24  ;;  %1228 = vmatprep.subr.bf16.mxu1 %v1217_v24 }
  0x4f   :  { %1220 = vmatpush3.bf16.xpose.msra.mxu0 %v1217_v24  ;;  %1236 = vmatpush3.bf16.xpose.msra.mxu1 %v1217_v24 }
  0x56   :  { %1166 = vmatmul.mubr.f32.vlgmr.msra.gmra.mrb[0].mxu0 %v42_v2  ;;  %1178 = vmatmul.mubr.f32.vlgmr.msra.gmra.mrb[0].mxu1 %v50_v14 }
  0x57   :  { %1168 = vmatprep.mubr.f32.mxu0 %v43_v3  ;;  %1180 = vmatprep.mubr.f32.mxu1 %v51_v16 }
  0x5a   :  { %1169 = vmatmul.mubr.f32.gmra.mrb[2].mxu0 %v44_v5  ;;  %1181 = vmatmul.mubr.f32.gmra.mrb[2].mxu1 %v52_v17 }
  0x5b   :  { %1171 = vmatprep.mubr.f32.mxu0 %v45_v8  ;;  %1183 = vmatprep.mubr.f32.mxu1 %v53_v19 }
  0x5e   :  { %1172 = vmatmul.mubr.f32.gmra.mrb[4].mxu0 %v46_v9  ;;  %1184 = vmatmul.mubr.f32.gmra.mrb[4].mxu1 %v54_v20 }
  0x5f   :  { %1174 = vmatprep.mubr.f32.mxu0 %v47_v11  ;;  %1186 = vmatprep.mubr.f32.mxu1 %v55_v22 }
  0x62   :  { %1175 = vmatmul.mubr.f32.gmra.mrb[6].mxu0 %v48_v12  ;;  %1187 = vmatmul.mubr.f32.gmra.mrb[6].mxu1 %v56_v23 }
 0x129   :  { %v1167_v27 = vpop.f32.mrb[0].mxu0  ;;  %v1179_v28 = vpop.f32.mrb[0].mxu1 }
 0x12a   :  { %v203_v29 = vmax.f32 %v1167_v27, 0.0005  ;;  %v123_v30 = vpop.f32.mrb[1].mxu0  ;;  %v163_v31 = vpop.f32.mrb[1].mxu1 }
 0x12b   :  { %v202_v32 = vmax.f32 %v123_v30, 0.0005 }
 0x12c   :  { %v219_v33 = vmin.f32 %v203_v29, 0.9995 }
 0x12d   :  { %v218_v34 = vmin.f32 %v202_v32, 0.9995  ;;  %v1170_v35 = vpop.f32.mrb[2].mxu0  ;;  %v1182_v36 = vpop.f32.mrb[2].mxu1 }
 0x12e   :  { %284 = vst [vmem:[#allocation2 + $0x8] sm:$0xff] %v219_v33  ;;  %v133_v37 = vpop.f32.mrb[3].mxu0  ;;  %v173_v38 = vpop.f32.mrb[3].mxu1 }
 0x12f   :  { %283 = vst [vmem:[#allocation2] sm:$0xff] %v218_v34  ;;  %v204_v39 = vmax.f32 %v133_v37, 0.0005 }
 0x131   :  { %v220_v40 = vmin.f32 %v204_v39, 0.9995  ;;  %v1173_v41 = vpop.f32.mrb[4].mxu0  ;;  %v1185_v42 = vpop.f32.mrb[4].mxu1 }
 0x132   :  { %v143_v43 = vpop.f32.mrb[5].mxu0  ;;  %v183_v44 = vpop.f32.mrb[5].mxu1 }
 0x133   :  { %285 = vst [vmem:[#allocation2 + $0x10] sm:$0xff] %v220_v40 }
 0x135   :  { %v1176_v45 = vpop.f32.mrb[6].mxu0  ;;  %v1188_v46 = vpop.f32.mrb[6].mxu1 }
 0x136   :  { %v153_v47 = vpop.f32.mrb[7].mxu0  ;;  %v193_v48 = vpop.f32.mrb[7].mxu1 }
 0x137 LB: > { %s1077_s20 = sshll.u32 %s1589_s0, 6  ;;  %v1717_v58 = vmov 0   ;;  %v1719_v59 = vmov 0   ;;  %v1721_v60 = vmov 0   ;;  %v1723_v61 = vmov 0   ;;  %s1749_s22 = smov 0   ;;  %s1589_s0 = sphi %s1692_s0, %s309_s0   ;;  %v1585_v49 = vphi %v1690_v49, %v2327_v49  }
 0x138   : > { %s312_s21 = scalar_lea.vmem [#allocation2], %s1077_s20  ;;  %v1725_v62 = vmov 0   ;;  %v1727_v63 = vmov 0   ;;  %v1729_v0 = vmov 0   ;;  %v1731_v1 = vmov 0  }
 0x139   : > { %v1733_v2 = vmov 0   ;;  %v1735_v3 = vmov 0   ;;  %v1737_v4 = vmov 0   ;;  %v1739_v5 = vmov 0  }
 0x13a   : > { %v1701_v50 = vld [vmem:[%s312_s21] sm:$0xff]  ;;  %v1703_v51 = vld [vmem:[%s312_s21 + $0x8] sm:$0xff]  ;;  %v1705_v52 = vld [vmem:[%s312_s21 + $0x10] sm:$0xff]  ;;  %v1741_v6 = vmov 0   ;;  %v1743_v7 = vmov 0   ;;  %v1745_v8 = vmov 0  }
 0x13b   : > { %v1707_v53 = vld [vmem:[%s312_s21 + $0x18] sm:$0xff]  ;;  %v1709_v54 = vld [vmem:[%s312_s21 + $0x20] sm:$0xff]  ;;  %v1711_v55 = vld [vmem:[%s312_s21 + $0x28] sm:$0xff]  ;;  %v1747_v9 = vmov 0  }
 0x13c   : > { %v1713_v56 = vld [vmem:[%s312_s21 + $0x30] sm:$0xff]  ;;  %v1715_v57 = vld [vmem:[%s312_s21 + $0x38] sm:$0xff] }
 0x13d LB: >> { %s1078_s23 = sshll.u32 %s1657_s22, 3  ;;  %v1663_v11 = vmov 0   ;;  %s326_s22 = sadd.s32 1, %s1657_s22   ;;  %s1657_s22 = sphi %s1749_s22, %s326_s22   ;;  %v1653_v9 = vphi %v1747_v9, %v2316_v9   ;;  %v1649_v8 = vphi %v1745_v8, %v2315_v8   ;;  %v1645_v7 = vphi %v1743_v7, %v2314_v7   ;;  %v1641_v6 = vphi %v1741_v6, %v2313_v6   ;;  %v1637_v5 = vphi %v1739_v5, %v2312_v5   ;;  %v1633_v4 = vphi %v1737_v4, %v2311_v4   ;;  %v1629_v3 = vphi %v1735_v3, %v2310_v3   ;;  %v1625_v2 = vphi %v1733_v2, %v2309_v2   ;;  %v1621_v1 = vphi %v1731_v1, %v2308_v1   ;;  %v1617_v0 = vphi %v1729_v0, %v2307_v0   ;;  %v1613_v63 = vphi %v1727_v63, %v2306_v63   ;;  %v1609_v62 = vphi %v1725_v62, %v2305_v62   ;;  %v1605_v61 = vphi %v1723_v61, %v2304_v61   ;;  %v1601_v60 = vphi %v1721_v60, %v2303_v60   ;;  %v1597_v59 = vphi %v1719_v59, %v2302_v59   ;;  %v1593_v58 = vphi %v1717_v58, %v2301_v58  }
 0x13e   : >> { %s1779_s24 = scalar_lea.vmem [#allocation2], %s1078_s23  ;;  %p2076_p8 = scmp.ge.s32.totalorder %s326_s22, 3  }
 0x13f   : >> { %v1079_v10 = vld [vmem:[%s1779_s24] ss:$0 sm:$0xff]  ;;  %v1082_v36 = vld [vmem:[%s1779_s24 + $0x1] ss:$0 sm:$0xff]  ;;  %1395 = vlog2.f32 (%p2076_p8), %v1701_v50  ;;  %s309_s0 = sadd.s32 (%p2076_p8), 1, %s1589_s0  }
 0x140   : >> { %vm350_vm1 = vcmp.gt.f32.partialorder %v1079_v10, %v1701_v50  ;;  %vm351_vm2 = vcmp.gt.f32.partialorder %v1079_v10, %v1703_v51  ;;  %vm352_vm3 = vcmp.gt.f32.partialorder %v1079_v10, %v1705_v52  ;;  %vm353_vm4 = vcmp.gt.f32.partialorder %v1079_v10, %v1707_v53  ;;  %p306_p9 = scmp.ge.s32.totalorder (%p2076_p8), %s309_s0, 2  }
 0x141   : >> { %vm354_vm5 = vcmp.gt.f32.partialorder %v1079_v10, %v1709_v54  ;;  %vm355_vm6 = vcmp.gt.f32.partialorder %v1079_v10, %v1711_v55  ;;  %vm356_vm7 = vcmp.gt.f32.partialorder %v1079_v10, %v1713_v56  ;;  %vm357_vm8 = vcmp.gt.f32.partialorder %v1079_v10, %v1715_v57 }
 0x142   : >> { %vm374_vm9 = vcmp.eq.f32.partialorder %v1079_v10, %v1701_v50  ;;  %vm375_vm10 = vcmp.eq.f32.partialorder %v1079_v10, %v1703_v51  ;;  %vm376_vm11 = vcmp.eq.f32.partialorder %v1079_v10, %v1705_v52  ;;  %v358_v12 = vsel %vm350_vm1, 1, %v1663_v11 }
 0x143   : >> { %v359_v13 = vsel %vm351_vm2, 1, %v1663_v11  ;;  %v360_v14 = vsel %vm352_vm3, 1, %v1663_v11  ;;  %v361_v15 = vsel %vm353_vm4, 1, %v1663_v11  ;;  %v362_v16 = vsel %vm354_vm5, 1, %v1663_v11 }
 0x144   : >> { %v363_v17 = vsel %vm355_vm6, 1, %v1663_v11  ;;  %v364_v18 = vsel %vm356_vm7, 1, %v1663_v11  ;;  %v365_v19 = vsel %vm357_vm8, 1, %v1663_v11  ;;  %v366_v20 = vadd.s32 %v1653_v9, %v358_v12 }
 0x145   : >> { %v367_v21 = vadd.s32 %v1649_v8, %v359_v13  ;;  %v368_v22 = vadd.s32 %v1645_v7, %v360_v14  ;;  %v369_v23 = vadd.s32 %v1641_v6, %v361_v15  ;;  %v370_v24 = vadd.s32 %v1637_v5, %v362_v16  ;;  %v1085_v15 = vld [vmem:[%s1779_s24 + $0x2] ss:$0 sm:$0xff] }
 0x146   : >> { %v371_v25 = vadd.s32 %v1633_v4, %v363_v17  ;;  %v372_v27 = vadd.s32 %v1629_v3, %v364_v18  ;;  %v373_v28 = vadd.s32 %v1625_v2, %v365_v19  ;;  %vm377_vm12 = vcmp.eq.f32.partialorder %v1079_v10, %v1707_v53 }
 0x147   : >> { %vm378_vm13 = vcmp.eq.f32.partialorder %v1079_v10, %v1709_v54  ;;  %vm379_vm14 = vcmp.eq.f32.partialorder %v1079_v10, %v1711_v55  ;;  %vm380_vm15 = vcmp.eq.f32.partialorder %v1079_v10, %v1713_v56  ;;  %vm381_vm1 = vcmp.eq.f32.partialorder %v1079_v10, %v1715_v57 }
 0x148   : >> { %v382_v29 = vsel %vm374_vm9, 1, %v1663_v11  ;;  %v383_v30 = vsel %vm375_vm10, 1, %v1663_v11  ;;  %v384_v31 = vsel %vm376_vm11, 1, %v1663_v11  ;;  %v385_v32 = vsel %vm377_vm12, 1, %v1663_v11 }
 0x149   : >> { %v386_v33 = vsel %vm378_vm13, 1, %v1663_v11  ;;  %v387_v34 = vsel %vm379_vm14, 1, %v1663_v11  ;;  %v388_v35 = vsel %vm380_vm15, 1, %v1663_v11  ;;  %v389_v37 = vsel %vm381_vm1, 1, %v1663_v11 }
 0x14a   : >> { %v390_v38 = vadd.s32 %v1621_v1, %v382_v29  ;;  %v391_v39 = vadd.s32 %v1617_v0, %v383_v30  ;;  %v392_v40 = vadd.s32 %v1613_v63, %v384_v31  ;;  %v393_v41 = vadd.s32 %v1609_v62, %v385_v32 }
 0x14b   : >> { %v394_v42 = vadd.s32 %v1605_v61, %v386_v33  ;;  %v395_v43 = vadd.s32 %v1601_v60, %v387_v34  ;;  %v396_v44 = vadd.s32 %v1597_v59, %v388_v35  ;;  %v397_v45 = vadd.s32 %v1593_v58, %v389_v37 }
 0x14c   : >> { %vm405_vm2 = vcmp.gt.f32.partialorder %v1082_v36, %v1701_v50  ;;  %vm406_vm3 = vcmp.gt.f32.partialorder %v1082_v36, %v1703_v51  ;;  %vm407_vm4 = vcmp.gt.f32.partialorder %v1082_v36, %v1705_v52  ;;  %vm408_vm5 = vcmp.gt.f32.partialorder %v1082_v36, %v1707_v53 }
 0x14d   : >> { %vm409_vm6 = vcmp.gt.f32.partialorder %v1082_v36, %v1709_v54  ;;  %vm410_vm7 = vcmp.gt.f32.partialorder %v1082_v36, %v1711_v55  ;;  %vm411_vm8 = vcmp.gt.f32.partialorder %v1082_v36, %v1713_v56  ;;  %vm412_vm9 = vcmp.gt.f32.partialorder %v1082_v36, %v1715_v57 }
 0x14e   : >> { %v413_v46 = vsel %vm405_vm2, 1, %v1663_v11  ;;  %v414_v47 = vsel %vm406_vm3, 1, %v1663_v11  ;;  %v415_v48 = vsel %vm407_vm4, 1, %v1663_v11  ;;  %v416_v58 = vsel %vm408_vm5, 1, %v1663_v11 }
 0x14f   : >> { %v417_v59 = vsel %vm409_vm6, 1, %v1663_v11  ;;  %v418_v60 = vsel %vm410_vm7, 1, %v1663_v11  ;;  %v419_v61 = vsel %vm411_vm8, 1, %v1663_v11  ;;  %v420_v62 = vsel %vm412_vm9, 1, %v1663_v11 }
 0x150   : >> { %v421_v63 = vadd.s32 %v413_v46, %v366_v20  ;;  %v422_v0 = vadd.s32 %v414_v47, %v367_v21  ;;  %v423_v1 = vadd.s32 %v415_v48, %v368_v22  ;;  %v424_v2 = vadd.s32 %v416_v58, %v369_v23  ;;  %v1088_v58 = vld [vmem:[%s1779_s24 + $0x3] ss:$0 sm:$0xff] }
 0x151   : >> { %v425_v3 = vadd.s32 %v417_v59, %v370_v24  ;;  %v426_v4 = vadd.s32 %v418_v60, %v371_v25  ;;  %v427_v5 = vadd.s32 %v419_v61, %v372_v27  ;;  %v428_v6 = vadd.s32 %v420_v62, %v373_v28 }
 0x152   : >> { %vm429_vm10 = vcmp.eq.f32.partialorder %v1082_v36, %v1701_v50  ;;  %vm430_vm11 = vcmp.eq.f32.partialorder %v1082_v36, %v1703_v51  ;;  %vm431_vm12 = vcmp.eq.f32.partialorder %v1082_v36, %v1705_v52  ;;  %vm432_vm13 = vcmp.eq.f32.partialorder %v1082_v36, %v1707_v53 }
 0x153   : >> { %vm433_vm14 = vcmp.eq.f32.partialorder %v1082_v36, %v1709_v54  ;;  %vm434_vm15 = vcmp.eq.f32.partialorder %v1082_v36, %v1711_v55  ;;  %vm435_vm1 = vcmp.eq.f32.partialorder %v1082_v36, %v1713_v56  ;;  %vm436_vm2 = vcmp.eq.f32.partialorder %v1082_v36, %v1715_v57 }
 0x154   : >> { %v437_v7 = vsel %vm429_vm10, 1, %v1663_v11  ;;  %v438_v8 = vsel %vm430_vm11, 1, %v1663_v11  ;;  %v439_v9 = vsel %vm431_vm12, 1, %v1663_v11  ;;  %v440_v10 = vsel %vm432_vm13, 1, %v1663_v11 }
 0x155   : >> { %v441_v12 = vsel %vm433_vm14, 1, %v1663_v11  ;;  %v442_v13 = vsel %vm434_vm15, 1, %v1663_v11  ;;  %v443_v14 = vsel %vm435_vm1, 1, %v1663_v11  ;;  %v444_v16 = vsel %vm436_vm2, 1, %v1663_v11 }
 0x156   : >> { %v445_v17 = vadd.s32 %v437_v7, %v390_v38  ;;  %v446_v18 = vadd.s32 %v438_v8, %v391_v39  ;;  %v447_v19 = vadd.s32 %v439_v9, %v392_v40  ;;  %v448_v20 = vadd.s32 %v440_v10, %v393_v41 }
 0x157   : >> { %v449_v21 = vadd.s32 %v441_v12, %v394_v42  ;;  %v450_v22 = vadd.s32 %v442_v13, %v395_v43  ;;  %v451_v23 = vadd.s32 %v443_v14, %v396_v44  ;;  %v452_v24 = vadd.s32 %v444_v16, %v397_v45 }
 0x158   : >> { %vm460_vm3 = vcmp.gt.f32.partialorder %v1085_v15, %v1701_v50  ;;  %vm461_vm4 = vcmp.gt.f32.partialorder %v1085_v15, %v1703_v51  ;;  %vm462_vm5 = vcmp.gt.f32.partialorder %v1085_v15, %v1705_v52  ;;  %vm463_vm6 = vcmp.gt.f32.partialorder %v1085_v15, %v1707_v53 }
 0x159   : >> { %vm464_vm7 = vcmp.gt.f32.partialorder %v1085_v15, %v1709_v54  ;;  %vm465_vm8 = vcmp.gt.f32.partialorder %v1085_v15, %v1711_v55  ;;  %vm466_vm9 = vcmp.gt.f32.partialorder %v1085_v15, %v1713_v56  ;;  %vm467_vm10 = vcmp.gt.f32.partialorder %v1085_v15, %v1715_v57 }
 0x15a   : >> { %v468_v25 = vsel %vm460_vm3, 1, %v1663_v11  ;;  %v469_v27 = vsel %vm461_vm4, 1, %v1663_v11  ;;  %v470_v28 = vsel %vm462_vm5, 1, %v1663_v11  ;;  %v471_v29 = vsel %vm463_vm6, 1, %v1663_v11 }
 0x15b   : >> { %v472_v30 = vsel %vm464_vm7, 1, %v1663_v11  ;;  %v473_v31 = vsel %vm465_vm8, 1, %v1663_v11  ;;  %v474_v32 = vsel %vm466_vm9, 1, %v1663_v11  ;;  %v475_v33 = vsel %vm467_vm10, 1, %v1663_v11 }
 0x15c   : >> { %v476_v34 = vadd.s32 %v468_v25, %v421_v63  ;;  %v477_v35 = vadd.s32 %v469_v27, %v422_v0  ;;  %v478_v36 = vadd.s32 %v470_v28, %v423_v1  ;;  %v479_v37 = vadd.s32 %v471_v29, %v424_v2  ;;  %v1091_v29 = vld [vmem:[%s1779_s24 + $0x4] ss:$0 sm:$0xff] }
 0x15d   : >> { %v480_v38 = vadd.s32 %v472_v30, %v425_v3  ;;  %v481_v39 = vadd.s32 %v473_v31, %v426_v4  ;;  %v482_v40 = vadd.s32 %v474_v32, %v427_v5  ;;  %v483_v41 = vadd.s32 %v475_v33, %v428_v6 }
 0x15e   : >> { %vm484_vm11 = vcmp.eq.f32.partialorder %v1085_v15, %v1701_v50  ;;  %vm485_vm12 = vcmp.eq.f32.partialorder %v1085_v15, %v1703_v51  ;;  %vm486_vm13 = vcmp.eq.f32.partialorder %v1085_v15, %v1705_v52  ;;  %vm487_vm14 = vcmp.eq.f32.partialorder %v1085_v15, %v1707_v53 }
 0x15f   : >> { %vm488_vm15 = vcmp.eq.f32.partialorder %v1085_v15, %v1709_v54  ;;  %vm489_vm1 = vcmp.eq.f32.partialorder %v1085_v15, %v1711_v55  ;;  %vm490_vm2 = vcmp.eq.f32.partialorder %v1085_v15, %v1713_v56  ;;  %vm491_vm3 = vcmp.eq.f32.partialorder %v1085_v15, %v1715_v57 }
 0x160   : >> { %v492_v42 = vsel %vm484_vm11, 1, %v1663_v11  ;;  %v493_v43 = vsel %vm485_vm12, 1, %v1663_v11  ;;  %v494_v44 = vsel %vm486_vm13, 1, %v1663_v11  ;;  %v495_v45 = vsel %vm487_vm14, 1, %v1663_v11 }
 0x161   : >> { %v496_v46 = vsel %vm488_vm15, 1, %v1663_v11  ;;  %v497_v47 = vsel %vm489_vm1, 1, %v1663_v11  ;;  %v498_v48 = vsel %vm490_vm2, 1, %v1663_v11  ;;  %v499_v59 = vsel %vm491_vm3, 1, %v1663_v11 }
 0x162   : >> { %v500_v60 = vadd.s32 %v492_v42, %v445_v17  ;;  %v501_v61 = vadd.s32 %v493_v43, %v446_v18  ;;  %v502_v62 = vadd.s32 %v494_v44, %v447_v19  ;;  %v503_v63 = vadd.s32 %v495_v45, %v448_v20 }
 0x163   : >> { %v504_v0 = vadd.s32 %v496_v46, %v449_v21  ;;  %v505_v1 = vadd.s32 %v497_v47, %v450_v22  ;;  %v506_v2 = vadd.s32 %v498_v48, %v451_v23  ;;  %v507_v3 = vadd.s32 %v499_v59, %v452_v24 }
 0x164   : >> { %vm515_vm4 = vcmp.gt.f32.partialorder %v1088_v58, %v1701_v50  ;;  %vm516_vm5 = vcmp.gt.f32.partialorder %v1088_v58, %v1703_v51  ;;  %vm517_vm6 = vcmp.gt.f32.partialorder %v1088_v58, %v1705_v52  ;;  %vm518_vm7 = vcmp.gt.f32.partialorder %v1088_v58, %v1707_v53 }
 0x165   : >> { %vm519_vm8 = vcmp.gt.f32.partialorder %v1088_v58, %v1709_v54  ;;  %vm520_vm9 = vcmp.gt.f32.partialorder %v1088_v58, %v1711_v55  ;;  %vm521_vm10 = vcmp.gt.f32.partialorder %v1088_v58, %v1713_v56  ;;  %vm522_vm11 = vcmp.gt.f32.partialorder %v1088_v58, %v1715_v57 }
 0x166   : >> { %v523_v4 = vsel %vm515_vm4, 1, %v1663_v11  ;;  %v524_v5 = vsel %vm516_vm5, 1, %v1663_v11  ;;  %v525_v6 = vsel %vm517_vm6, 1, %v1663_v11  ;;  %v526_v7 = vsel %vm518_vm7, 1, %v1663_v11 }
 0x167   : >> { %v527_v8 = vsel %vm519_vm8, 1, %v1663_v11  ;;  %v528_v9 = vsel %vm520_vm9, 1, %v1663_v11  ;;  %v529_v10 = vsel %vm521_vm10, 1, %v1663_v11  ;;  %v530_v12 = vsel %vm522_vm11, 1, %v1663_v11 }
 0x168   : >> { %v531_v13 = vadd.s32 %v523_v4, %v476_v34  ;;  %v532_v14 = vadd.s32 %v524_v5, %v477_v35  ;;  %v533_v15 = vadd.s32 %v525_v6, %v478_v36  ;;  %v534_v16 = vadd.s32 %v526_v7, %v479_v37  ;;  %v1094_v7 = vld [vmem:[%s1779_s24 + $0x5] ss:$0 sm:$0xff] }
 0x169   : >> { %v535_v17 = vadd.s32 %v527_v8, %v480_v38  ;;  %v536_v18 = vadd.s32 %v528_v9, %v481_v39  ;;  %v537_v19 = vadd.s32 %v529_v10, %v482_v40  ;;  %v538_v20 = vadd.s32 %v530_v12, %v483_v41 }
 0x16a   : >> { %vm539_vm12 = vcmp.eq.f32.partialorder %v1088_v58, %v1701_v50  ;;  %vm540_vm13 = vcmp.eq.f32.partialorder %v1088_v58, %v1703_v51  ;;  %vm541_vm14 = vcmp.eq.f32.partialorder %v1088_v58, %v1705_v52  ;;  %vm542_vm15 = vcmp.eq.f32.partialorder %v1088_v58, %v1707_v53 }
 0x16b   : >> { %vm543_vm1 = vcmp.eq.f32.partialorder %v1088_v58, %v1709_v54  ;;  %vm544_vm2 = vcmp.eq.f32.partialorder %v1088_v58, %v1711_v55  ;;  %vm545_vm3 = vcmp.eq.f32.partialorder %v1088_v58, %v1713_v56  ;;  %vm546_vm4 = vcmp.eq.f32.partialorder %v1088_v58, %v1715_v57 }
 0x16c   : >> { %v547_v21 = vsel %vm539_vm12, 1, %v1663_v11  ;;  %v548_v22 = vsel %vm540_vm13, 1, %v1663_v11  ;;  %v549_v23 = vsel %vm541_vm14, 1, %v1663_v11  ;;  %v550_v24 = vsel %vm542_vm15, 1, %v1663_v11 }
 0x16d   : >> { %v551_v25 = vsel %vm543_vm1, 1, %v1663_v11  ;;  %v552_v27 = vsel %vm544_vm2, 1, %v1663_v11  ;;  %v553_v28 = vsel %vm545_vm3, 1, %v1663_v11  ;;  %v554_v30 = vsel %vm546_vm4, 1, %v1663_v11 }
 0x16e   : >> { %v555_v31 = vadd.s32 %v547_v21, %v500_v60  ;;  %v556_v32 = vadd.s32 %v548_v22, %v501_v61  ;;  %v557_v33 = vadd.s32 %v549_v23, %v502_v62  ;;  %v558_v34 = vadd.s32 %v550_v24, %v503_v63 }
 0x16f   : >> { %v559_v35 = vadd.s32 %v551_v25, %v504_v0  ;;  %v560_v36 = vadd.s32 %v552_v27, %v505_v1  ;;  %v561_v37 = vadd.s32 %v553_v28, %v506_v2  ;;  %v562_v38 = vadd.s32 %v554_v30, %v507_v3 }
 0x170   : >> { %vm570_vm5 = vcmp.gt.f32.partialorder %v1091_v29, %v1701_v50  ;;  %vm571_vm6 = vcmp.gt.f32.partialorder %v1091_v29, %v1703_v51  ;;  %vm572_vm7 = vcmp.gt.f32.partialorder %v1091_v29, %v1705_v52  ;;  %vm573_vm8 = vcmp.gt.f32.partialorder %v1091_v29, %v1707_v53 }
 0x171   : >> { %vm574_vm9 = vcmp.gt.f32.partialorder %v1091_v29, %v1709_v54  ;;  %vm575_vm10 = vcmp.gt.f32.partialorder %v1091_v29, %v1711_v55  ;;  %vm576_vm11 = vcmp.gt.f32.partialorder %v1091_v29, %v1713_v56  ;;  %vm577_vm12 = vcmp.gt.f32.partialorder %v1091_v29, %v1715_v57 }
 0x172   : >> { %v578_v39 = vsel %vm570_vm5, 1, %v1663_v11  ;;  %v579_v40 = vsel %vm571_vm6, 1, %v1663_v11  ;;  %v580_v41 = vsel %vm572_vm7, 1, %v1663_v11  ;;  %v581_v42 = vsel %vm573_vm8, 1, %v1663_v11 }
 0x173   : >> { %v582_v43 = vsel %vm574_vm9, 1, %v1663_v11  ;;  %v583_v44 = vsel %vm575_vm10, 1, %v1663_v11  ;;  %v584_v45 = vsel %vm576_vm11, 1, %v1663_v11  ;;  %v585_v46 = vsel %vm577_vm12, 1, %v1663_v11 }
 0x174   : >> { %v586_v47 = vadd.s32 %v578_v39, %v531_v13  ;;  %v587_v48 = vadd.s32 %v579_v40, %v532_v14  ;;  %v588_v58 = vadd.s32 %v580_v41, %v533_v15  ;;  %v589_v59 = vadd.s32 %v581_v42, %v534_v16  ;;  %v1097_v42 = vld [vmem:[%s1779_s24 + $0x6] ss:$0 sm:$0xff] }
 0x175   : >> { %v590_v60 = vadd.s32 %v582_v43, %v535_v17  ;;  %v591_v61 = vadd.s32 %v583_v44, %v536_v18  ;;  %v592_v62 = vadd.s32 %v584_v45, %v537_v19  ;;  %v593_v63 = vadd.s32 %v585_v46, %v538_v20 }
 0x176   : >> { %vm594_vm13 = vcmp.eq.f32.partialorder %v1091_v29, %v1701_v50  ;;  %vm595_vm14 = vcmp.eq.f32.partialorder %v1091_v29, %v1703_v51  ;;  %vm596_vm15 = vcmp.eq.f32.partialorder %v1091_v29, %v1705_v52  ;;  %vm597_vm1 = vcmp.eq.f32.partialorder %v1091_v29, %v1707_v53 }
 0x177   : >> { %vm598_vm2 = vcmp.eq.f32.partialorder %v1091_v29, %v1709_v54  ;;  %vm599_vm3 = vcmp.eq.f32.partialorder %v1091_v29, %v1711_v55  ;;  %vm600_vm4 = vcmp.eq.f32.partialorder %v1091_v29, %v1713_v56  ;;  %vm601_vm5 = vcmp.eq.f32.partialorder %v1091_v29, %v1715_v57 }
 0x178   : >> { %v602_v0 = vsel %vm594_vm13, 1, %v1663_v11  ;;  %v603_v1 = vsel %vm595_vm14, 1, %v1663_v11  ;;  %v604_v2 = vsel %vm596_vm15, 1, %v1663_v11  ;;  %v605_v3 = vsel %vm597_vm1, 1, %v1663_v11 }
 0x179   : >> { %v606_v4 = vsel %vm598_vm2, 1, %v1663_v11  ;;  %v607_v5 = vsel %vm599_vm3, 1, %v1663_v11  ;;  %v608_v6 = vsel %vm600_vm4, 1, %v1663_v11  ;;  %v609_v8 = vsel %vm601_vm5, 1, %v1663_v11 }
 0x17a   : >> { %v610_v9 = vadd.s32 %v602_v0, %v555_v31  ;;  %v611_v10 = vadd.s32 %v603_v1, %v556_v32  ;;  %v612_v12 = vadd.s32 %v604_v2, %v557_v33  ;;  %v613_v13 = vadd.s32 %v605_v3, %v558_v34 }
 0x17b   : >> { %v614_v14 = vadd.s32 %v606_v4, %v559_v35  ;;  %v615_v15 = vadd.s32 %v607_v5, %v560_v36  ;;  %v616_v16 = vadd.s32 %v608_v6, %v561_v37  ;;  %v617_v17 = vadd.s32 %v609_v8, %v562_v38 }
 0x17c   : >> { %vm625_vm6 = vcmp.gt.f32.partialorder %v1094_v7, %v1701_v50  ;;  %vm626_vm7 = vcmp.gt.f32.partialorder %v1094_v7, %v1703_v51  ;;  %vm627_vm8 = vcmp.gt.f32.partialorder %v1094_v7, %v1705_v52  ;;  %vm628_vm9 = vcmp.gt.f32.partialorder %v1094_v7, %v1707_v53 }
 0x17d   : >> { %vm629_vm10 = vcmp.gt.f32.partialorder %v1094_v7, %v1709_v54  ;;  %vm630_vm11 = vcmp.gt.f32.partialorder %v1094_v7, %v1711_v55  ;;  %vm631_vm12 = vcmp.gt.f32.partialorder %v1094_v7, %v1713_v56  ;;  %vm632_vm13 = vcmp.gt.f32.partialorder %v1094_v7, %v1715_v57 }
 0x17e   : >> { %v633_v18 = vsel %vm625_vm6, 1, %v1663_v11  ;;  %v634_v19 = vsel %vm626_vm7, 1, %v1663_v11  ;;  %v635_v20 = vsel %vm627_vm8, 1, %v1663_v11  ;;  %v636_v21 = vsel %vm628_vm9, 1, %v1663_v11 }
 0x17f   : >> { %v637_v22 = vsel %vm629_vm10, 1, %v1663_v11  ;;  %v638_v23 = vsel %vm630_vm11, 1, %v1663_v11  ;;  %v639_v24 = vsel %vm631_vm12, 1, %v1663_v11  ;;  %v640_v25 = vsel %vm632_vm13, 1, %v1663_v11 }
 0x180   : >> { %v641_v27 = vadd.s32 %v633_v18, %v586_v47  ;;  %v642_v28 = vadd.s32 %v634_v19, %v587_v48  ;;  %v643_v29 = vadd.s32 %v635_v20, %v588_v58  ;;  %v644_v30 = vadd.s32 %v636_v21, %v589_v59  ;;  %v1100_v21 = vld [vmem:[%s1779_s24 + $0x7] ss:$0 sm:$0xff] }
 0x181   : >> { %v645_v31 = vadd.s32 %v637_v22, %v590_v60  ;;  %v646_v32 = vadd.s32 %v638_v23, %v591_v61  ;;  %v647_v33 = vadd.s32 %v639_v24, %v592_v62  ;;  %v648_v34 = vadd.s32 %v640_v25, %v593_v63 }
 0x182   : >> { %vm649_vm14 = vcmp.eq.f32.partialorder %v1094_v7, %v1701_v50  ;;  %vm650_vm15 = vcmp.eq.f32.partialorder %v1094_v7, %v1703_v51  ;;  %vm651_vm1 = vcmp.eq.f32.partialorder %v1094_v7, %v1705_v52  ;;  %vm652_vm2 = vcmp.eq.f32.partialorder %v1094_v7, %v1707_v53 }
 0x183   : >> { %vm653_vm3 = vcmp.eq.f32.partialorder %v1094_v7, %v1709_v54  ;;  %vm654_vm4 = vcmp.eq.f32.partialorder %v1094_v7, %v1711_v55  ;;  %vm655_vm5 = vcmp.eq.f32.partialorder %v1094_v7, %v1713_v56  ;;  %vm656_vm6 = vcmp.eq.f32.partialorder %v1094_v7, %v1715_v57 }
 0x184   : >> { %v657_v35 = vsel %vm649_vm14, 1, %v1663_v11  ;;  %v658_v36 = vsel %vm650_vm15, 1, %v1663_v11  ;;  %v659_v37 = vsel %vm651_vm1, 1, %v1663_v11  ;;  %v660_v38 = vsel %vm652_vm2, 1, %v1663_v11 }
 0x185   : >> { %v661_v39 = vsel %vm653_vm3, 1, %v1663_v11  ;;  %v662_v40 = vsel %vm654_vm4, 1, %v1663_v11  ;;  %v663_v41 = vsel %vm655_vm5, 1, %v1663_v11  ;;  %v664_v43 = vsel %vm656_vm6, 1, %v1663_v11 }
 0x186   : >> { %v665_v44 = vadd.s32 %v657_v35, %v610_v9  ;;  %v666_v45 = vadd.s32 %v658_v36, %v611_v10  ;;  %v667_v46 = vadd.s32 %v659_v37, %v612_v12  ;;  %v668_v47 = vadd.s32 %v660_v38, %v613_v13 }
 0x187   : >> { %v669_v48 = vadd.s32 %v661_v39, %v614_v14  ;;  %v670_v58 = vadd.s32 %v662_v40, %v615_v15  ;;  %v671_v59 = vadd.s32 %v663_v41, %v616_v16  ;;  %v672_v60 = vadd.s32 %v664_v43, %v617_v17 }
 0x188   : >> { %vm680_vm7 = vcmp.gt.f32.partialorder %v1097_v42, %v1701_v50  ;;  %vm681_vm8 = vcmp.gt.f32.partialorder %v1097_v42, %v1703_v51  ;;  %vm682_vm9 = vcmp.gt.f32.partialorder %v1097_v42, %v1705_v52  ;;  %vm683_vm10 = vcmp.gt.f32.partialorder %v1097_v42, %v1707_v53 }
 0x189   : >> { %vm684_vm11 = vcmp.gt.f32.partialorder %v1097_v42, %v1709_v54  ;;  %vm685_vm12 = vcmp.gt.f32.partialorder %v1097_v42, %v1711_v55  ;;  %vm686_vm13 = vcmp.gt.f32.partialorder %v1097_v42, %v1713_v56  ;;  %vm687_vm14 = vcmp.gt.f32.partialorder %v1097_v42, %v1715_v57 }
 0x18a   : >> { %v688_v61 = vsel %vm680_vm7, 1, %v1663_v11  ;;  %v689_v62 = vsel %vm681_vm8, 1, %v1663_v11  ;;  %v690_v63 = vsel %vm682_vm9, 1, %v1663_v11  ;;  %v691_v0 = vsel %vm683_vm10, 1, %v1663_v11 }
 0x18b   : >> { %v692_v1 = vsel %vm684_vm11, 1, %v1663_v11  ;;  %v693_v2 = vsel %vm685_vm12, 1, %v1663_v11  ;;  %v694_v3 = vsel %vm686_vm13, 1, %v1663_v11  ;;  %v695_v4 = vsel %vm687_vm14, 1, %v1663_v11 }
 0x18c   : >> { %v696_v5 = vadd.s32 %v688_v61, %v641_v27  ;;  %v697_v6 = vadd.s32 %v689_v62, %v642_v28  ;;  %v698_v7 = vadd.s32 %v690_v63, %v643_v29  ;;  %v699_v8 = vadd.s32 %v691_v0, %v644_v30 }
 0x18d   : >> { %v700_v9 = vadd.s32 %v692_v1, %v645_v31  ;;  %v701_v10 = vadd.s32 %v693_v2, %v646_v32  ;;  %v702_v12 = vadd.s32 %v694_v3, %v647_v33  ;;  %v703_v13 = vadd.s32 %v695_v4, %v648_v34 }
 0x18e   : >> { %vm704_vm15 = vcmp.eq.f32.partialorder %v1097_v42, %v1701_v50  ;;  %vm705_vm1 = vcmp.eq.f32.partialorder %v1097_v42, %v1703_v51  ;;  %vm706_vm2 = vcmp.eq.f32.partialorder %v1097_v42, %v1705_v52  ;;  %vm707_vm3 = vcmp.eq.f32.partialorder %v1097_v42, %v1707_v53 }
 0x18f   : >> { %vm708_vm4 = vcmp.eq.f32.partialorder %v1097_v42, %v1709_v54  ;;  %vm709_vm5 = vcmp.eq.f32.partialorder %v1097_v42, %v1711_v55  ;;  %vm710_vm6 = vcmp.eq.f32.partialorder %v1097_v42, %v1713_v56  ;;  %vm711_vm7 = vcmp.eq.f32.partialorder %v1097_v42, %v1715_v57 }
 0x190   : >> { %v712_v14 = vsel %vm704_vm15, 1, %v1663_v11  ;;  %v713_v15 = vsel %vm705_vm1, 1, %v1663_v11  ;;  %v714_v16 = vsel %vm706_vm2, 1, %v1663_v11  ;;  %v715_v17 = vsel %vm707_vm3, 1, %v1663_v11 }
 0x191   : >> { %v716_v18 = vsel %vm708_vm4, 1, %v1663_v11  ;;  %v717_v19 = vsel %vm709_vm5, 1, %v1663_v11  ;;  %v718_v20 = vsel %vm710_vm6, 1, %v1663_v11  ;;  %v719_v22 = vsel %vm711_vm7, 1, %v1663_v11 }
 0x192   : >> { %v720_v23 = vadd.s32 %v712_v14, %v665_v44  ;;  %v721_v24 = vadd.s32 %v713_v15, %v666_v45  ;;  %v722_v25 = vadd.s32 %v714_v16, %v667_v46  ;;  %v723_v27 = vadd.s32 %v715_v17, %v668_v47 }
 0x193   : >> { %v724_v28 = vadd.s32 %v716_v18, %v669_v48  ;;  %v725_v29 = vadd.s32 %v717_v19, %v670_v58  ;;  %v726_v30 = vadd.s32 %v718_v20, %v671_v59  ;;  %v727_v31 = vadd.s32 %v719_v22, %v672_v60 }
 0x194   : >> { %vm735_vm8 = vcmp.gt.f32.partialorder %v1100_v21, %v1701_v50  ;;  %vm736_vm9 = vcmp.gt.f32.partialorder %v1100_v21, %v1703_v51  ;;  %vm737_vm10 = vcmp.gt.f32.partialorder %v1100_v21, %v1705_v52  ;;  %vm738_vm11 = vcmp.gt.f32.partialorder %v1100_v21, %v1707_v53 }
 0x195   : >> { %vm739_vm12 = vcmp.gt.f32.partialorder %v1100_v21, %v1709_v54  ;;  %vm740_vm13 = vcmp.gt.f32.partialorder %v1100_v21, %v1711_v55  ;;  %vm741_vm14 = vcmp.gt.f32.partialorder %v1100_v21, %v1713_v56  ;;  %vm742_vm15 = vcmp.gt.f32.partialorder %v1100_v21, %v1715_v57 }
 0x196   : >> { %v743_v32 = vsel %vm735_vm8, 1, %v1663_v11  ;;  %v744_v33 = vsel %vm736_vm9, 1, %v1663_v11  ;;  %v745_v34 = vsel %vm737_vm10, 1, %v1663_v11  ;;  %v746_v35 = vsel %vm738_vm11, 1, %v1663_v11 }
 0x197   : >> { %v747_v36 = vsel %vm739_vm12, 1, %v1663_v11  ;;  %v748_v37 = vsel %vm740_vm13, 1, %v1663_v11  ;;  %v749_v38 = vsel %vm741_vm14, 1, %v1663_v11  ;;  %v750_v39 = vsel %vm742_vm15, 1, %v1663_v11 }
 0x198   : >> { %v751_v40 = vadd.s32 %v743_v32, %v696_v5   ;;  %v752_v41 = vadd.s32 %v744_v33, %v697_v6   ;;  %v753_v42 = vadd.s32 %v745_v34, %v698_v7   ;;  %v754_v43 = vadd.s32 %v746_v35, %v699_v8  }
 0x199   : >> { %v755_v44 = vadd.s32 %v747_v36, %v700_v9   ;;  %v756_v45 = vadd.s32 %v748_v37, %v701_v10   ;;  %v2039_v3 = vadd.s32 %v749_v38, %v702_v12   ;;  %v2041_v2 = vadd.s32 %v750_v39, %v703_v13  }
 0x19a   : >> { %vm759_vm1 = vcmp.eq.f32.partialorder %v1100_v21, %v1701_v50  ;;  %vm760_vm2 = vcmp.eq.f32.partialorder %v1100_v21, %v1703_v51  ;;  %vm761_vm3 = vcmp.eq.f32.partialorder %v1100_v21, %v1705_v52  ;;  %vm762_vm4 = vcmp.eq.f32.partialorder %v1100_v21, %v1707_v53 }
 0x19b   : >> { %v2290_v46 = vmov %v2039_v3  ;;  %v2291_v47 = vmov %v2041_v2  ;;  %vm763_vm5 = vcmp.eq.f32.partialorder %v1100_v21, %v1709_v54  ;;  %vm764_vm6 = vcmp.eq.f32.partialorder %v1100_v21, %v1711_v55 }
 0x19c   : >> { %vm765_vm7 = vcmp.eq.f32.partialorder %v1100_v21, %v1713_v56  ;;  %vm766_vm8 = vcmp.eq.f32.partialorder %v1100_v21, %v1715_v57  ;;  %v767_v48 = vsel %vm759_vm1, 1, %v1663_v11  ;;  %v768_v58 = vsel %vm760_vm2, 1, %v1663_v11 }
 0x19d   : >> { %v769_v59 = vsel %vm761_vm3, 1, %v1663_v11  ;;  %v770_v60 = vsel %vm762_vm4, 1, %v1663_v11  ;;  %v771_v61 = vsel %vm763_vm5, 1, %v1663_v11  ;;  %v772_v62 = vsel %vm764_vm6, 1, %v1663_v11 }
 0x19e   : >> { %v773_v63 = vsel %vm765_vm7, 1, %v1663_v11  ;;  %v774_v0 = vsel %vm766_vm8, 1, %v1663_v11  ;;  %v2059_v1 = vadd.s32 %v767_v48, %v720_v23   ;;  %v2061_v2 = vadd.s32 %v768_v58, %v721_v24  }
 0x19f   : >> { %v2063_v3 = vadd.s32 %v769_v59, %v722_v25   ;;  %v2065_v4 = vadd.s32 %v770_v60, %v723_v27   ;;  %v2067_v61 = vadd.s32 %v771_v61, %v724_v28   ;;  %v2069_v60 = vadd.s32 %v772_v62, %v725_v29  }
 0x1a0   : >> { %v2292_v10 = vmov %v2059_v1  ;;  %v2293_v12 = vmov %v2061_v2  ;;  %v2071_v59 = vadd.s32 %v773_v63, %v726_v30   ;;  %v2073_v58 = vadd.s32 %v774_v0, %v727_v31   ;;  %325 = sbr.rel (!%p2076_p8) target bundleno = 317 (0x13d), region = 52 }
 0x1a1   : >> { %v2294_v13 = vmov %v2063_v3  ;;  %v2295_v14 = vmov %v2065_v4  ;;  %v2296_v15 = vmov %v2067_v61  ;;  %v2297_v16 = vmov %v2069_v60 }
 0x1a2   : >> { %v2298_v17 = vmov %v2071_v59  ;;  %v2299_v18 = vmov %v2073_v58  ;;  %v2303_v60 = vmov %v2297_v16  ;;  %v2304_v61 = vmov %v2296_v15 }
 0x1a3   : >> { %v2301_v58 = vmov %v2299_v18  ;;  %v2302_v59 = vmov %v2298_v17  ;;  %v2305_v62 = vmov %v2295_v14  ;;  %v2306_v63 = vmov %v2294_v13  ;;  %v1396_v60 = vpop.eup (%p2076_p8), %1395 }
 0x1a4   : >> { %v2307_v0 = vmov %v2293_v12  ;;  %v2308_v1 = vmov %v2292_v10  ;;  %v2309_v2 = vmov %v2291_v47  ;;  %v2310_v3 = vmov %v2290_v46 }
 0x1a5   : >> { %v2311_v4 = vmov %v756_v45  ;;  %v2312_v5 = vmov %v755_v44  ;;  %v2313_v6 = vmov %v754_v43  ;;  %v2314_v7 = vmov %v753_v42 }
 0x1a6   : >> { %v2315_v8 = vmov %v752_v41  ;;  %v2316_v9 = vmov %v751_v40  ;;  %v783_v11 = vcvt.s32.f32 (%p2076_p8), %v751_v40  ;;  %v785_v19 = vcvt.s32.f32 (%p2076_p8), %v753_v42 }
 0x1a7   : > { %v784_v9 = vcvt.s32.f32 %v752_v41  ;;  %v786_v20 = vcvt.s32.f32 %v754_v43  ;;  %v787_v21 = vcvt.s32.f32 %v755_v44  ;;  %v788_v22 = vcvt.s32.f32 %v756_v45  ;;  %s1664_s26 = smov (%p306_p9), [#allocation6]  }
 0x1a8   : > { %v789_v23 = vcvt.s32.f32 %v2290_v46  ;;  %v790_v24 = vcvt.s32.f32 %v2291_v47  ;;  %v823_v25 = vsub.f32 1.0, %v783_v11  ;;  %v825_v28 = vsub.f32 1.0, %v785_v19  ;;  %s982_s27 = sshll.u32 (%p306_p9), %s1664_s26, 4  ;;  %s983_s27 = int_to_ptr.vmem [resolvable:$true] %s982_s27 }
 0x1a9   : > { %v824_v27 = vsub.f32 1.0, %v784_v9  ;;  %1397 = vlog2.f32 %v1703_v51  ;;  %v826_v29 = vsub.f32 1.0, %v786_v20  ;;  %v827_v30 = vsub.f32 1.0, %v787_v21  ;;  %s1481_s28 = scalar_lea.vmem (%p306_p9), %s983_s27, 16  ;;  %s1485_s29 = scalar_lea.vmem (%p306_p9), %s983_s27, 32 }
 0x1aa   : > { %v828_v31 = vsub.f32 1.0, %v788_v22  ;;  %1399 = vlog2.f32 %v1705_v52  ;;  %v829_v1 = vsub.f32 1.0, %v789_v23  ;;  %v830_v5 = vsub.f32 1.0, %v790_v24  ;;  %p1482_p10 = scmp.ne.s32.totalorder (%p306_p9), %s983_s27, %s1481_s28  ;;  %p1486_p11 = scmp.lt.s32.totalorder (%p306_p9), %s983_s27, %s983_s27 }
 0x1ab   : > { %v831_v6 = vmul.f32 0.25, %v823_v25  ;;  %1401 = vlog2.f32 %v1707_v53  ;;  %v832_v7 = vmul.f32 0.25, %v824_v27  ;;  %v833_v8 = vmul.f32 0.25, %v825_v28  ;;  %p1487_p12 = scmp.lt.s32.totalorder (%p306_p9), %s1485_s29, %s1481_s28 }
 0x1ac   : > { %v834_v32 = vmul.f32 0.25, %v826_v29  ;;  %v791_v33 = vcvt.s32.f32 %v2292_v10  ;;  %v792_v34 = vcvt.s32.f32 %v2293_v12  ;;  %1403 = vlog2.f32 %v1709_v54 }
 0x1ad   : > { %v835_v35 = vmul.f32 0.25, %v827_v30  ;;  %1405 = vlog2.f32 %v1711_v55  ;;  %v836_v36 = vmul.f32 0.25, %v828_v31  ;;  %v839_v37 = vmul.f32 1.442695, %v831_v6  ;;  %p1488_p13 = por (%p306_p9), %p1487_p12, %p1486_p11 }
 0x1ae   : > { %v841_v38 = vmul.f32 1.442695, %v832_v7  ;;  %v793_v39 = vcvt.s32.f32 %v2294_v13  ;;  %1407 = vlog2.f32 %v1713_v56  ;;  %v837_v40 = vmul.f32 0.25, %v829_v1 }
 0x1af   : > { %v843_v41 = vmul.f32 1.442695, %v833_v8  ;;  %v794_v42 = vcvt.s32.f32 %v2295_v14  ;;  %1409 = vlog2.f32 %v1715_v57  ;;  %v838_v43 = vmul.f32 0.25, %v830_v5  ;;  %p1489_p0 = pnand (%p306_p9), %p1488_p13, %p1482_p10 }
 0x1b0   : > { %v845_v44 = vmul.f32 1.442695, %v834_v32  ;;  %v795_v45 = vcvt.s32.f32 %v2296_v15  ;;  %1411 = vpow2.f32 %v839_v37  ;;  %v847_v46 = vmul.f32 1.442695, %v835_v35 }
 0x1b1   : > { %v855_v47 = vmul.f32 -0.25, %v791_v33  ;;  %v796_v48 = vcvt.s32.f32 %v2297_v16  ;;  %1413 = vpow2.f32 %v841_v38  ;;  %v849_v58 = vmul.f32 1.442695, %v836_v36 }
 0x1b2   : > { %v856_v59 = vmul.f32 -0.25, %v792_v34  ;;  %v797_v61 = vcvt.s32.f32 %v2298_v17  ;;  %1415 = vpow2.f32 %v843_v41  ;;  %v851_v62 = vmul.f32 1.442695, %v837_v40 }
 0x1b3   : > { %v857_v63 = vmul.f32 -0.25, %v793_v39  ;;  %v1398_v0 = vpop.eup %1397  ;;  %v798_v2 = vcvt.s32.f32 %v2299_v18  ;;  %1417 = vpow2.f32 %v845_v44  ;;  %v853_v3 = vmul.f32 1.442695, %v838_v43 }
 0x1b4   : > { %v858_v4 = vmul.f32 -0.25, %v794_v42  ;;  %v1400_v15 = vpop.eup %1399  ;;  %1419 = vpow2.f32 %v847_v46  ;;  %v859_v11 = vmul.f32 -0.25, %v795_v45  ;;  %v863_v9 = vmul.f32 1.442695, %v855_v47 }
 0x1b5   : > { %v1402_v19 = vpop.eup %1401  ;;  %1421 = vpow2.f32 %v849_v58  ;;  %v860_v20 = vmul.f32 -0.25, %v796_v48  ;;  %v865_v21 = vmul.f32 1.442695, %v856_v59  ;;  %v861_v23 = vmul.f32 -0.25, %v797_v61 }
 0x1b6   : > { %v1404_v22 = vpop.eup %1403  ;;  %1423 = vpow2.f32 %v851_v62  ;;  %v867_v24 = vmul.f32 1.442695, %v857_v63  ;;  %v862_v27 = vmul.f32 -0.25, %v798_v2  ;;  %v869_v28 = vmul.f32 1.442695, %v858_v4 }
 0x1b7   : > { %v1406_v25 = vpop.eup %1405  ;;  %1425 = vpow2.f32 %v853_v3  ;;  %v871_v30 = vmul.f32 1.442695, %v859_v11  ;;  %v873_v1 = vmul.f32 1.442695, %v860_v20  ;;  %v875_v6 = vmul.f32 1.442695, %v861_v23 }
 0x1b8   : > { %v1408_v29 = vpop.eup %1407  ;;  %1427 = vpow2.f32 %v863_v9  ;;  %v877_v8 = vmul.f32 1.442695, %v862_v27  ;;  %v903_v35 = vmax.f32 %v791_v33, 1.0  ;;  %v2160_v37 = vmul.f32 0.6931472, %v1396_v60 }
 0x1b9   : > { %v1410_v31 = vpop.eup %1409  ;;  %1429 = vpow2.f32 %v865_v21  ;;  %v904_v38 = vmax.f32 %v792_v34, 1.0  ;;  %v2164_v41 = vmul.f32 0.6931472, %v1398_v0  ;;  %v2166_v43 = vmul.f32 0.6931472, %v1400_v15 }
 0x1ba   : > { %v1412_v5 = vpop.eup %1411  ;;  %1431 = vpow2.f32 %v867_v24  ;;  %v905_v44 = vmax.f32 %v793_v39, 1.0  ;;  %v906_v10 = vmax.f32 %v794_v42, 1.0  ;;  %v2172_v47 = vmul.f32 0.6931472, %v1402_v19 }
 0x1bb   : > { %v1414_v7 = vpop.eup %1413  ;;  %1433 = vpow2.f32 %v869_v28  ;;  %v907_v58 = vmax.f32 %v795_v45, 1.0  ;;  %v2174_v34 = vmul.f32 0.6931472, %v1404_v22  ;;  %v815_v59 = vsub.f32 0.0, %v2160_v37 }
 0x1bc   : > { %v1416_v32 = vpop.eup %1415  ;;  %1435 = vpow2.f32 %v871_v30  ;;  %v908_v60 = vmax.f32 %v796_v48, 1.0  ;;  %v816_v39 = vsub.f32 0.0, %v2164_v41  ;;  %v817_v14 = vsub.f32 0.0, %v2166_v43 }
 0x1bd   : > { %v1418_v36 = vpop.eup %1417  ;;  %1437 = vpow2.f32 %v873_v1  ;;  %v909_v42 = vmax.f32 %v797_v61, 1.0  ;;  %v2183_v62 = vmul.f32 0.6931472, %v1406_v25  ;;  %v910_v0 = vmax.f32 %v798_v2, 1.0 }
 0x1be   : > { %v1420_v40 = vpop.eup %1419  ;;  %1439 = vpow2.f32 %v875_v6  ;;  %v2187_v48 = vmul.f32 0.6931472, %v1408_v29  ;;  %v818_v3 = vsub.f32 0.0, %v2172_v47  ;;  %v819_v17 = vsub.f32 0.0, %v2174_v34 }
 0x1bf   : > { %v1422_v46 = vpop.eup %1421  ;;  %1441 = vpow2.f32 %v877_v8  ;;  %v2191_v19 = vmul.f32 0.6931472, %v1410_v31  ;;  %v820_v25 = vsub.f32 0.0, %v2183_v62  ;;  %vm927_vm9 = vcmp.gt.f32.partialorder %v1701_v50, 0.0 }
 0x1c0   : > { %v1424_v33 = vpop.eup %1423  ;;  %1443 = vrcp.f32 %v903_v35  ;;  %vm928_vm10 = vcmp.gt.f32.partialorder %v1703_v51, 0.0  ;;  %vm929_vm11 = vcmp.gt.f32.partialorder %v1705_v52, 0.0  ;;  %vm930_vm12 = vcmp.gt.f32.partialorder %v1707_v53, 0.0  ;;  %vm2202_vm13 = vmand %vm927_vm9, %vm303_vm0 }
 0x1c1   : > { %v1426_v12 = vpop.eup %1425  ;;  %1445 = vrcp.f32 %v904_v38  ;;  %vm2211_vm14 = vmand %vm928_vm10, %vm303_vm0  ;;  %vm931_vm15 = vcmp.gt.f32.partialorder %v1709_v54, 0.0  ;;  %v822_v37 = vsub.f32 0.0, %v2191_v19  ;;  %vm932_vm3 = vcmp.gt.f32.partialorder %v1711_v55, 0.0 }
 0x1c2   : > { %v1428_v13 = vpop.eup %1427  ;;  %1447 = vrcp.f32 %v905_v44  ;;  %vm2222_vm1 = vmand %vm929_vm11, %vm303_vm0  ;;  %vm933_vm5 = vcmp.gt.f32.partialorder %v1713_v56, 0.0  ;;  %vm934_vm7 = vcmp.gt.f32.partialorder %v1715_v57, 0.0 }
 0x1c3   : > { %v1430_v45 = vpop.eup %1429  ;;  %v879_v63 = vsub.f32 1.0, %v1428_v13  ;;  %1449 = vrcp.f32 %v906_v10  ;;  %vm2233_vm2 = vmand %vm930_vm12, %vm303_vm0 }
 0x1c4   : > { %v1432_v16 = vpop.eup %1431  ;;  %v880_v4 = vsub.f32 1.0, %v1430_v45  ;;  %1451 = vrcp.f32 %v907_v58  ;;  %vm2250_vm4 = vmand %vm931_vm15, %vm303_vm0 }
 0x1c5   : > { %v1434_v15 = vpop.eup %1433  ;;  %v881_v61 = vsub.f32 1.0, %v1432_v16  ;;  %v887_v11 = vmul.f32 %v1412_v5, %v879_v63  ;;  %1453 = vrcp.f32 %v908_v60  ;;  %vm942_vm6 = vmand %vm932_vm3, %vm303_vm0 }
 0x1c6   : > { %v1436_v9 = vpop.eup %1435  ;;  %v882_v20 = vsub.f32 1.0, %v1434_v15  ;;  %v888_v18 = vmul.f32 %v1414_v7, %v880_v4  ;;  %1455 = vrcp.f32 %v909_v42  ;;  %vm943_vm8 = vmand %vm933_vm5, %vm303_vm0 }
 0x1c7   : > { %v1438_v2 = vpop.eup %1437  ;;  %v883_v21 = vsub.f32 1.0, %v1436_v9  ;;  %v889_v22 = vmul.f32 %v1416_v32, %v881_v61  ;;  %v895_v23 = vmul.f32 4.5208116, %v887_v11  ;;  %1457 = vrcp.f32 %v910_v0  ;;  %vm944_vm9 = vmand %vm934_vm7, %vm303_vm0 }
 0x1c8   : > { %v1440_v24 = vpop.eup %1439  ;;  %v884_v27 = vsub.f32 1.0, %v1438_v2  ;;  %v890_v28 = vmul.f32 %v1418_v36, %v882_v20  ;;  %v896_v29 = vmul.f32 4.5208116, %v888_v18 }
 0x1c9   : > { %v1442_v30 = vpop.eup %1441  ;;  %v885_v1 = vsub.f32 1.0, %v1440_v24  ;;  %v891_v5 = vmul.f32 %v1420_v40, %v883_v21  ;;  %v897_v6 = vmul.f32 4.5208116, %v889_v22 }
 0x1ca   : > { %v1444_v31 = vpop.eup %1443  ;;  %v886_v7 = vsub.f32 1.0, %v1442_v30  ;;  %v892_v8 = vmul.f32 %v1422_v46, %v884_v27  ;;  %v898_v35 = vmul.f32 4.5208116, %v890_v28 }
 0x1cb   : > { %v1446_v32 = vpop.eup %1445  ;;  %v893_v38 = vmul.f32 %v1424_v33, %v885_v1  ;;  %v899_v44 = vmul.f32 4.5208116, %v891_v5  ;;  %v912_v10 = vmul.f32 %v1444_v31, %v895_v23  ;;  %v821_v33 = vsub.f32 0.0, %v2187_v48 }
 0x1cc   : > { %v1448_v36 = vpop.eup %1447  ;;  %v894_v58 = vmul.f32 %v1426_v12, %v886_v7  ;;  %v900_v60 = vmul.f32 4.5208116, %v892_v8  ;;  %v914_v13 = vmul.f32 %v1446_v32, %v896_v29 }
 0x1cd   : > { %v1450_v46 = vpop.eup %1449  ;;  %v901_v42 = vmul.f32 4.5208116, %v893_v38  ;;  %v916_v45 = vmul.f32 %v1448_v36, %v897_v6  ;;  %v945_v50 = vmul.f32 %v912_v10, %v815_v59 }
 0x1ce   : > { %v1452_v62 = vpop.eup %1451  ;;  %v902_v63 = vmul.f32 4.5208116, %v894_v58  ;;  %v918_v0 = vmul.f32 %v1450_v46, %v898_v35  ;;  %v946_v51 = vmul.f32 %v914_v13, %v816_v39 }
 0x1cf   : > { %v1454_v48 = vpop.eup %1453  ;;  %v920_v59 = vmul.f32 %v1452_v62, %v899_v44  ;;  %v947_v52 = vmul.f32 %v916_v45, %v817_v14  ;;  %v953_v15 = vsel %vm2202_vm13, %v945_v50, 0.0 }
 0x1d0   : > { %v1456_v41 = vpop.eup %1455  ;;  %v922_v39 = vmul.f32 %v1454_v48, %v900_v60  ;;  %v948_v61 = vmul.f32 %v918_v0, %v818_v3  ;;  %v954_v53 = vsel %vm2211_vm14, %v946_v51, 0.0 }
 0x1d1   : > { %v1458_v11 = vpop.eup %1457  ;;  %v924_v9 = vmul.f32 %v1456_v41, %v901_v42  ;;  %v949_v14 = vmul.f32 %v920_v59, %v819_v17  ;;  %v955_v55 = vsel %vm2222_vm1, %v947_v52, 0.0  ;;  %v961_v47 = vadd.f32 %v954_v53, %v953_v15 }
 0x1d2   : > { %v926_v3 = vmul.f32 %v1458_v11, %v902_v63  ;;  %v950_v19 = vmul.f32 %v922_v39, %v820_v25  ;;  %v956_v20 = vsel %vm2233_vm2, %v948_v61, 0.0 }
 0x1d3   : > { %v962_v54 = vadd.f32 %v961_v47, %v955_v55  ;;  %v951_v18 = vmul.f32 %v924_v9, %v821_v33  ;;  %v957_v34 = vsel %vm2250_vm4, %v949_v14, 0.0 }
 0x1d4   : > { %v952_v2 = vmul.f32 %v926_v3, %v822_v37  ;;  %v958_v56 = vsel %vm942_vm6, %v950_v19, 0.0 }
 0x1d5   : > { %v963_v17 = vadd.f32 %v962_v54, %v956_v20  ;;  %v959_v22 = vsel %vm943_vm8, %v951_v18, 0.0 }
 0x1d6   : > { %v960_v24 = vsel %vm944_vm9, %v952_v2, 0.0 }
 0x1d7   : > { %v964_v21 = vadd.f32 %v963_v17, %v957_v34 }
 0x1d9   : > { %v965_v23 = vadd.f32 %v964_v21, %v958_v56 }
 0x1db   : > { %v966_v25 = vadd.f32 %v965_v23, %v959_v22 }
 0x1dd   : > { %v967_v27 = vadd.f32 %v966_v25, %v960_v24 }
 0x1df   : > { %v968_v57 = vrot.slane %v967_v27, 4 }
 0x1e1   : > { %v969_v28 = vadd.f32 %v968_v57, %v967_v27 }
 0x1e3   : > { %v970_v29 = vrot.slane %v969_v28, 2 }
 0x1e5   : > { %v971_v30 = vadd.f32 %v970_v29, %v969_v28 }
 0x1e7   : > { %v972_v1 = vrot.slane %v971_v30, 1  ;;  %308 = sbr.rel (!%p306_p9) target bundleno = 311 (0x137), region = 63 }
 0x1e9   : > { %v973_v5 = vadd.f32 %v972_v1, %v971_v30 }
 0x1eb   : > { %v974_v6 = vadd.f32 %v1585_v49, %v973_v5  }
 0x1ed   : > { %v2327_v49 = vmov %v974_v6  ;;  %975 = vst [vmem:[#allocation6] sm:$0x1] (%p306_p9), %v974_v6 }
 0x1ee   :  { %1492 = shalt.err (!%p1489_p0)
}
 0x1ef   :  { %s1493_s3 = scalar_lea.hbm %s2289_s1, 16 }
 0x1f0   :  { %p1494_p1 = scmp.ne.s32.totalorder %s2289_s1, %s1493_s3  ;;  %p1497_p2 = scmp.lt.u32.totalorder %s1493_s3, %s2289_s1 }
 0x1f2   :  { %p1499_p3 = pnand %p1497_p2, %p1494_p1 }
 0x1f4   :  { %1502 = shalt.err (!%p1499_p3)
}
 0x1f5   :  { %985 = dma.vmem_to_hbm [thread:$0]  %s983_s27, 16, %s2289_s1, [#allocation5]  }
 0x1f6   :  { %1581 = dma.done.wait [#allocation5], 16  }
 0x1f7   :  { %1582 = vsyncadd [#allocation5], 4294967280 }
 0x1f8   :  { %989 = vsyncpa [#allocation4], 1 }
 0x1f9   :  { %990 = vsyncpa [#allocation5], 1 }

</bundles_post_ra>
